<compile_context>
chip_gen: v6e
topology: v6e:2x2x1
jax: 0.10.0
libtpu: 0.0.40
codegen_flags: <defaults>
</compile_context>

<pallas_src>
from functools import partial

import numpy as np
import jax
import jax.numpy as jnp
from jax.experimental import pallas as pl
from jax.experimental.pallas import tpu as pltpu


_VMEM_LIMIT = 48 * 1024 * 1024  # <= v7x safe ceiling (~56 MiB of 64 MiB phys)


def _compiler_params():
    return pltpu.CompilerParams(
        dimension_semantics=("parallel",),   # batch-blocked grid: dual-TC split
        vmem_limit_bytes=_VMEM_LIMIT,
    )


# ---------------------------------------------------------------------------
# Pallas kernels
# ---------------------------------------------------------------------------
def _tapconv_relu_kernel(x_ref, w_ref, b_ref, o_ref, *, ho, wo, kth, ktw):
    """Stride-1 tap conv as a single MXU matmul + bias + ReLU.

    x_ref: (B, Hq, Wq, C')        batch tile of space-to-depth input (bf16)
    w_ref: (kth*ktw*C', Cout)     tap-concatenated weights (bf16)
    b_ref: (1, Cout)              f32
    o_ref: (1, Cout, B*ho*wo)     lane-dense output slab
    """
    b, _, _, c = x_ref.shape
    x = x_ref[...].astype(jnp.float32)            # slice/concat on f32 layout
    # Tap concat -> one (M, taps*C') operand instead of taps separate matmuls.
    patch = jnp.concatenate(
        [x[:, kh:kh + ho, kw:kw + wo, :]
         for kh in range(kth) for kw in range(ktw)], axis=-1)
    patch = patch.reshape(b * ho * wo, kth * ktw * c).astype(jnp.bfloat16)
    y = jnp.dot(patch, w_ref[...], preferred_element_type=jnp.float32)
    y = jnp.maximum(y + b_ref[...], 0.0)          # bias + ReLU in f32
    o_ref[0] = y.T.astype(o_ref.dtype)            # (Cout, M): lane-dense store


def _fused_l34_kernel(x_ref, w3_ref, b3_ref, w4_ref, b4_ref, o_ref, ypad_ref,
                      *, ho, wo):
    """Fused layer3 (2x2-tap conv on s2d input) + layer4 (3x3, pad 1) + ReLUs.

    Layer-3 activations never touch HBM: they are written (inside a zeroed
    1-element border) into the small f32 VMEM scratch `ypad_ref` and consumed
    by the single layer-4 tap-concat matmul in the same kernel invocation.
    """
    b, _, _, cin3 = x_ref.shape
    c3 = w3_ref.shape[-1]
    x = x_ref[...].astype(jnp.float32)

    # ---- layer 3: one matmul, K = 4*cin3 ----
    p3 = jnp.concatenate(
        [x[:, kh:kh + ho, kw:kw + wo, :]
         for kh in range(2) for kw in range(2)], axis=-1)
    p3 = p3.reshape(b * ho * wo, 4 * cin3).astype(jnp.bfloat16)
    y3 = jnp.dot(p3, w3_ref[...], preferred_element_type=jnp.float32)
    y3 = jnp.maximum(y3 + b3_ref[...], 0.0)

    # ---- pad=1 halo via VMEM scratch: zero ONLY the border every step
    #      (interior is fully overwritten; never program_id-gated so it is
    #      megacore-safe).  Scratch is tiny, kept f32 for cheap relayouts. ----
    zr = jnp.zeros((b, 1, wo + 2, c3), ypad_ref.dtype)
    ypad_ref[:, 0:1, :, :] = zr
    ypad_ref[:, ho + 1:ho + 2, :, :] = zr
    zc = jnp.zeros((b, ho + 2, 1, c3), ypad_ref.dtype)
    ypad_ref[:, :, 0:1, :] = zc
    ypad_ref[:, :, wo + 1:wo + 2, :] = zc
    ypad_ref[:, 1:1 + ho, 1:1 + wo, :] = y3.reshape(b, ho, wo, c3)
    yp = ypad_ref[...]

    # ---- layer 4: one matmul, K = 9*c3 ----
    p4 = jnp.concatenate(
        [yp[:, kh:kh + ho, kw:kw + wo, :]
         for kh in range(3) for kw in range(3)], axis=-1)
    p4 = p4.reshape(b * ho * wo, 9 * c3).astype(jnp.bfloat16)
    y4 = jnp.dot(p4, w4_ref[...], preferred_element_type=jnp.float32)
    y4 = jnp.maximum(y4 + b4_ref[...], 0.0)
    o_ref[0] = y4.T.astype(o_ref.dtype)           # lane-dense (Cout, M) store


# ---------------------------------------------------------------------------
# pallas_call wrappers (grid over batch blocks, "parallel")
# ---------------------------------------------------------------------------
def _tapconv_relu(x_s2d, w_cat, bias, ho, wo, b_tile, out_dtype, kth=2, ktw=2):
    n, hq, wq, cq = x_s2d.shape
    kcat, cout = w_cat.shape
    assert n % b_tile == 0 and kcat == kth * ktw * cq
    nb = n // b_tile
    m = b_tile * ho * wo
    kernel = partial(_tapconv_relu_kernel, ho=ho, wo=wo, kth=kth, ktw=ktw)
    return pl.pallas_call(
        kernel,
        out_shape=jax.ShapeDtypeStruct((nb, cout, m), out_dtype),
        grid=(nb,),
        in_specs=[
            pl.BlockSpec((b_tile, hq, wq, cq), lambda i: (i, 0, 0, 0)),
            pl.BlockSpec((kcat, cout), lambda i: (0, 0)),
            pl.BlockSpec((1, cout), lambda i: (0, 0)),
        ],
        out_specs=pl.BlockSpec((1, cout, m), lambda i: (i, 0, 0)),
        compiler_params=_compiler_params(),
    )(x_s2d, w_cat, bias)


def _fused_l34(x_s2d, w3, b3, w4, b4, ho, wo, b_tile, out_dtype):
    n, hq, wq, cq = x_s2d.shape
    k3, c3 = w3.shape
    k4, c4 = w4.shape
    assert n % b_tile == 0 and k3 == 4 * cq and k4 == 9 * c3
    nb = n // b_tile
    m = b_tile * ho * wo
    kernel = partial(_fused_l34_kernel, ho=ho, wo=wo)
    return pl.pallas_call(
        kernel,
        out_shape=jax.ShapeDtypeStruct((nb, c4, m), out_dtype),
        grid=(nb,),
        in_specs=[
            pl.BlockSpec((b_tile, hq, wq, cq), lambda i: (i, 0, 0, 0)),
            pl.BlockSpec((k3, c3), lambda i: (0, 0)),
            pl.BlockSpec((1, c3), lambda i: (0, 0)),
            pl.BlockSpec((k4, c4), lambda i: (0, 0)),
            pl.BlockSpec((1, c4), lambda i: (0, 0)),
        ],
        out_specs=pl.BlockSpec((1, c4, m), lambda i: (i, 0, 0)),
        scratch_shapes=[pltpu.VMEM((b_tile, ho + 2, wo + 2, c3), jnp.float32)],
        compiler_params=_compiler_params(),
    )(x_s2d, w3, b3, w4, b4)


# ---------------------------------------------------------------------------
# XLA glue: pad + space-to-depth (stride-2 conv -> stride-1 2x2-tap conv),
# batch blocking, and lane-dense-slab -> NHWC plumbing.
# ---------------------------------------------------------------------------
def _pad_s2d(x_nhwc, k, s, p):
    """x_hat[n,i,j,(rh*s+rw)*C+c] = x_pad[n, s*i+rh, s*j+rw, c].  1x traffic."""
    n, h, w, c = x_nhwc.shape
    ho = (h + 2 * p - k) // s + 1
    wo = (w + 2 * p - k) // s + 1
    hp = max(h + 2 * p, (ho - 1) * s + k)
    wp = max(w + 2 * p, (wo - 1) * s + k)
    hp += (-hp) % s
    wp += (-wp) % s
    xp = jnp.pad(x_nhwc, ((0, 0), (p, hp - h - p), (p, wp - w - p), (0, 0)))
    xh = xp.reshape(n, hp // s, s, wp // s, s, c)
    xh = jnp.transpose(xh, (0, 1, 3, 2, 4, 5)).reshape(
        n, hp // s, wp // s, s * s * c)
    return xh, ho, wo


def _pick_b_tile(n, m_per_item, target_m=256):
    """Enough images per grid step to give the MXU M >= ~256 rows, while
    keeping >= 2 grid steps (pipelining / dual-TC) whenever the batch allows."""
    bt = min(n, max(1, -(-target_m // m_per_item)))
    while bt > 1 and -(-n // bt) < 2:
        bt = max(1, bt // 2)
    return bt


def _pad_batch(x, b_tile):
    pad = -x.shape[0] % b_tile
    if pad:
        x = jnp.pad(x, ((0, pad),) + ((0, 0),) * (x.ndim - 1))
    return x


def _slab_to_nhwc(slab, n, b_tile, ho, wo):
    """(nb, Cout, b_tile*ho*wo) lane-dense slab -> (n, ho, wo, Cout)."""
    nb, cout, _ = slab.shape
    y = slab.reshape(nb, cout, b_tile, ho, wo)
    y = jnp.transpose(y, (0, 2, 3, 4, 1)).reshape(nb * b_tile, ho, wo, cout)
    return y[:n]


# ---------------------------------------------------------------------------
# Parameter preparation (hoisted out of the per-forward path)
# ---------------------------------------------------------------------------
def _pack_w_strided(w, s):
    """(Cout,Cin,K,K) -> ((K//s)^2 taps, s*s*Cin, Cout), matching _pad_s2d."""
    cout, cin, k, _ = w.shape
    kq = k // s
    wr = w.reshape(cout, cin, kq, s, kq, s)          # (co, ci, qh, rh, qw, rw)
    wr = jnp.transpose(wr, (2, 4, 3, 5, 1, 0))       # (qh, qw, rh, rw, ci, co)
    return wr.reshape(kq * kq, s * s * cin, cout)


def _pack_w_s1(w):
    """(Cout,Cin,KH,KW) -> (KH*KW taps, Cin, Cout)."""
    cout, cin, kh, kw = w.shape
    return jnp.transpose(w, (2, 3, 1, 0)).reshape(kh * kw, cin, cout)


def _cat_taps(w_taps):
    """(taps, K_tap, Cout) -> (taps*K_tap, Cout) bf16 — tap-major row order
    matching the kernels' concat([win_t0, win_t1, ...], axis=-1)."""
    t, k, co = w_taps.shape
    return w_taps.reshape(t * k, co).astype(jnp.bfloat16)


def prepare_params(params):
    (w1, b1), (w2, b2), (w3, b3), (w4, b4) = params
    f32 = jnp.float32
    return (
        (_cat_taps(_pack_w_strided(w1, 2)), b1.reshape(1, -1).astype(f32)),
        (_cat_taps(_pack_w_strided(w2, 2)), b2.reshape(1, -1).astype(f32)),
        (_cat_taps(_pack_w_strided(w3, 2)), b3.reshape(1, -1).astype(f32)),
        (_cat_taps(_pack_w_s1(w4)), b4.reshape(1, -1).astype(f32)),
    )


# ---------------------------------------------------------------------------
# Full encoder forward
# ---------------------------------------------------------------------------
def convnet_encoder2(x_nchw, prepared):
    (w1, b1), (w2, b2), (w3, b3), (w4, b4) = prepared
    n = x_nchw.shape[0]
    # NCHW -> NHWC; bf16 activations throughout (halves activation DMA).
    x = jnp.transpose(x_nchw, (0, 2, 3, 1)).astype(jnp.bfloat16)

    # layer 1
    xs, ho, wo = _pad_s2d(x, k=4, s=2, p=1)
    bt = _pick_b_tile(n, ho * wo)
    slab = _tapconv_relu(_pad_batch(xs, bt), w1, b1, ho, wo, bt, jnp.bfloat16)
    x = _slab_to_nhwc(slab, n, bt, ho, wo)

    # layer 2
    xs, ho, wo = _pad_s2d(x, k=4, s=2, p=1)
    bt = _pick_b_tile(n, ho * wo)
    slab = _tapconv_relu(_pad_batch(xs, bt), w2, b2, ho, wo, bt, jnp.bfloat16)
    x = _slab_to_nhwc(slab, n, bt, ho, wo)

    # layers 3 + 4 fused (layer-3 output stays in VMEM)
    xs, ho, wo = _pad_s2d(x, k=4, s=2, p=1)
    bt = _pick_b_tile(n, ho * wo)
    slab = _fused_l34(_pad_batch(xs, bt), w3, b3, w4, b4, ho, wo, bt,
                      jnp.float32)
    # NHWC output == .permute(0, 2, 3, 1) of the NCHW conv stack.
    return _slab_to_nhwc(slab, n, bt, ho, wo)


# ---------------------------------------------------------------------------
# Deterministic parameter init (PyTorch-default-style uniform bounds)
# ---------------------------------------------------------------------------
def init_conv(key, cin, cout, k):
    fan_in = cin * k * k
    bound = 1.0 / np.sqrt(fan_in)
    kw, kb = jax.random.split(key)
    w = jax.random.uniform(kw, (cout, cin, k, k), jnp.float32, -bound, bound)
    b = jax.random.uniform(kb, (cout,), jnp.float32, -bound, bound)
    return w, b


def make_params(key, in_channels, out_channels):
    half = out_channels // 2
    keys = jax.random.split(key, 4)
    return (
        init_conv(keys[0], in_channels, half, 4),
        init_conv(keys[1], half, half, 4),
        init_conv(keys[2], half, out_channels, 4),
        init_conv(keys[3], out_channels, out_channels, 3),
    )


# ---------------------------------------------------------------------------
# Pure-JAX reference (f32 lax.conv) for the correctness check
# ---------------------------------------------------------------------------
def _ref_layer(x_nchw, w, b, stride, pad):
    y = jax.lax.conv_general_dilated(
        x_nchw, w, (stride, stride), [(pad, pad), (pad, pad)],
        dimension_numbers=("NCHW", "OIHW", "NCHW"))
    y = y + b[None, :, None, None]
    return jnp.maximum(y, 0.0)


def convnet_encoder2_ref(x_nchw, params):
    (w1, b1), (w2, b2), (w3, b3), (w4, b4) = params
    x = _ref_layer(x_nchw, w1, b1, 2, 1)
    x = _ref_layer(x, w2, b2, 2, 1)
    x = _ref_layer(x, w3, b3, 2, 1)
    x = _ref_layer(x, w4, b4, 1, 1)
    return jnp.transpose(x, (0, 2, 3, 1))                # permute(0, 2, 3, 1)


if __name__ == "__main__":
    in_channels, out_channels = 4, 32
    batch, hw = 8, 16                                    # small; exercises
                                                         # batch blocking (bt=4)
    key = jax.random.PRNGKey(0)
    k_x, k_p = jax.random.split(key)

    x = jax.random.normal(k_x, (batch, in_channels, hw, hw), jnp.float32)
    params = make_params(k_p, in_channels, out_channels)
    prepared = prepare_params(params)                    # packed once, reused

    fwd = jax.jit(convnet_encoder2)
    out = jax.block_until_ready(fwd(x, prepared))

    ref = jax.block_until_ready(convnet_encoder2_ref(x, params))

    assert out.shape == (batch, 2, 2, out_channels), out.shape
    assert np.allclose(np.asarray(out, np.float32), np.asarray(ref),
                       atol=3e-2, rtol=3e-2), \
        "Pallas output mismatch vs JAX reference (bf16-operand tolerance)"

    print("KERNEL_OK")
</pallas_src>

<mosaic_0001>
module attributes {stable_mosaic.version = 11 : i64} {
  func.func @_tapconv_relu_kernel(%arg0: i32, %arg1: memref<4x9x9x16xbf16, #tpu.memory_space<vmem>>, %arg2: memref<64x16xbf16, #tpu.memory_space<vmem>>, %arg3: memref<1x16xf32, #tpu.memory_space<vmem>>, %arg4: memref<1x16x256xbf16, #tpu.memory_space<vmem>>) attributes {dimension_semantics = [#tpu.dimension_semantics<parallel>], iteration_bounds = array<i64: 2>, scalar_prefetch = 0 : i64, scratch_operands = 0 : i64, tpu.core_type = #tpu.core_type<tc>, window_params = [{transform_indices = @transform_0, window_bounds = array<i64: 4, 9, 9, 16>}, {pipeline_mode = #tpu.pipeline_mode<synchronous>, transform_indices = @transform_1, window_bounds = array<i64: 64, 16>}, {pipeline_mode = #tpu.pipeline_mode<synchronous>, transform_indices = @transform_2, window_bounds = array<i64: 1, 16>}, {transform_indices = @transform_3, window_bounds = array<i64: 1, 16, 256>}]} {
    %c0 = arith.constant 0 : index
    %c0_0 = arith.constant 0 : index
    %c0_1 = arith.constant 0 : index
    %c0_2 = arith.constant 0 : index
    %0 = vector.load %arg1[%c0, %c0_0, %c0_1, %c0_2] : memref<4x9x9x16xbf16, #tpu.memory_space<vmem>>, vector<4x9x9x16xbf16>
    %1 = arith.extf %0 : vector<4x9x9x16xbf16> to vector<4x9x9x16xf32>
    %2 = vector.extract_strided_slice %1 {offsets = [0, 0, 0, 0], sizes = [4, 8, 8, 16], strides = [1, 1, 1, 1]} : vector<4x9x9x16xf32> to vector<4x8x8x16xf32>
    %3 = vector.extract_strided_slice %1 {offsets = [0, 0, 1, 0], sizes = [4, 8, 8, 16], strides = [1, 1, 1, 1]} : vector<4x9x9x16xf32> to vector<4x8x8x16xf32>
    %4 = vector.extract_strided_slice %1 {offsets = [0, 1, 0, 0], sizes = [4, 8, 8, 16], strides = [1, 1, 1, 1]} : vector<4x9x9x16xf32> to vector<4x8x8x16xf32>
    %5 = vector.extract_strided_slice %1 {offsets = [0, 1, 1, 0], sizes = [4, 8, 8, 16], strides = [1, 1, 1, 1]} : vector<4x9x9x16xf32> to vector<4x8x8x16xf32>
    %6 = tpu.concatenate %2, %3, %4, %5 in 3 : vector<4x8x8x16xf32>, vector<4x8x8x16xf32>, vector<4x8x8x16xf32>, vector<4x8x8x16xf32> -> vector<4x8x8x64xf32>
    %7 = vector.shape_cast %6 : vector<4x8x8x64xf32> to vector<256x64xf32>
    %8 = arith.truncf %7 : vector<256x64xf32> to vector<256x64xbf16>
    %c0_3 = arith.constant 0 : index
    %c0_4 = arith.constant 0 : index
    %9 = vector.load %arg2[%c0_3, %c0_4] : memref<64x16xbf16, #tpu.memory_space<vmem>>, vector<64x16xbf16>
    %cst = arith.constant dense<0.000000e+00> : vector<256x16xf32>
    %10 = tpu.matmul %8, %9, %cst {dimension_numbers = #tpu.dot_dimension_numbers<[1], [0], [0], [1], [0, 0, 1, 1], [], []>} : vector<256x64xbf16>, vector<64x16xbf16>, vector<256x16xf32> -> vector<256x16xf32>
    %c0_5 = arith.constant 0 : index
    %c0_6 = arith.constant 0 : index
    %11 = vector.load %arg3[%c0_5, %c0_6] : memref<1x16xf32, #tpu.memory_space<vmem>>, vector<1x16xf32>
    %12 = vector.broadcast %11 : vector<1x16xf32> to vector<256x16xf32>
    %13 = arith.addf %10, %12 : vector<256x16xf32>
    %cst_7 = arith.constant 0.000000e+00 : f32
    %14 = vector.broadcast %cst_7 : f32 to vector<256x16xf32>
    %15 = arith.maximumf %13, %14 : vector<256x16xf32>
    %16 = tpu.transpose %15, [1, 0] : vector<256x16xf32> -> vector<16x256xf32>
    %17 = arith.truncf %16 : vector<16x256xf32> to vector<16x256xbf16>
    %c0_8 = arith.constant 0 : index
    %c0_9 = arith.constant 0 : index
    %c0_10 = arith.constant 0 : index
    %18 = vector.load %arg4[%c0_8, %c0_9, %c0_10] : memref<1x16x256xbf16, #tpu.memory_space<vmem>>, vector<1x16x256xbf16>
    %19 = vector.shape_cast %18 : vector<1x16x256xbf16> to vector<16x256xbf16>
    %20 = vector.shape_cast %17 : vector<16x256xbf16> to vector<1x16x256xbf16>
    tpu.vector_store %arg4[%c0_8, %c0_9, %c0_10], %20 {strides = array<i32>} : memref<1x16x256xbf16, #tpu.memory_space<vmem>>, vector<1x16x256xbf16>,
    return
  }
  func.func @transform_0(%arg0: i32) -> (i32, i32, i32, i32) {
    %c0_i32 = arith.constant 0 : i32
    %c0_i32_0 = arith.constant 0 : i32
    %c0_i32_1 = arith.constant 0 : i32
    %c0_i32_2 = arith.constant 0 : i32
    return %arg0, %c0_i32, %c0_i32_0, %c0_i32_1 : i32, i32, i32, i32
  }
  func.func @transform_1(%arg0: i32) -> (i32, i32) {
    %c0_i32 = arith.constant 0 : i32
    %c0_i32_0 = arith.constant 0 : i32
    %c0_i32_1 = arith.constant 0 : i32
    return %c0_i32, %c0_i32_0 : i32, i32
  }
  func.func @transform_2(%arg0: i32) -> (i32, i32) {
    %c0_i32 = arith.constant 0 : i32
    %c0_i32_0 = arith.constant 0 : i32
    %c0_i32_1 = arith.constant 0 : i32
    return %c0_i32, %c0_i32_0 : i32, i32
  }
  func.func @transform_3(%arg0: i32) -> (i32, i32, i32) {
    %c0_i32 = arith.constant 0 : i32
    %c0_i32_0 = arith.constant 0 : i32
    %c0_i32_1 = arith.constant 0 : i32
    return %arg0, %c0_i32, %c0_i32_0 : i32, i32, i32
  }
}

module attributes {stable_mosaic.version = 11 : i64} {
  func.func @_tapconv_relu_kernel(%arg0: i32, %arg1: memref<4x5x5x64xbf16, #tpu.memory_space<vmem>>, %arg2: memref<256x16xbf16, #tpu.memory_space<vmem>>, %arg3: memref<1x16xf32, #tpu.memory_space<vmem>>, %arg4: memref<1x16x64xbf16, #tpu.memory_space<vmem>>) attributes {dimension_semantics = [#tpu.dimension_semantics<parallel>], iteration_bounds = array<i64: 2>, scalar_prefetch = 0 : i64, scratch_operands = 0 : i64, tpu.core_type = #tpu.core_type<tc>, window_params = [{transform_indices = @transform_0, window_bounds = array<i64: 4, 5, 5, 64>}, {pipeline_mode = #tpu.pipeline_mode<synchronous>, transform_indices = @transform_1, window_bounds = array<i64: 256, 16>}, {pipeline_mode = #tpu.pipeline_mode<synchronous>, transform_indices = @transform_2, window_bounds = array<i64: 1, 16>}, {transform_indices = @transform_3, window_bounds = array<i64: 1, 16, 64>}]} {
    %c0 = arith.constant 0 : index
    %c0_0 = arith.constant 0 : index
    %c0_1 = arith.constant 0 : index
    %c0_2 = arith.constant 0 : index
    %0 = vector.load %arg1[%c0, %c0_0, %c0_1, %c0_2] : memref<4x5x5x64xbf16, #tpu.memory_space<vmem>>, vector<4x5x5x64xbf16>
    %1 = arith.extf %0 : vector<4x5x5x64xbf16> to vector<4x5x5x64xf32>
    %2 = vector.extract_strided_slice %1 {offsets = [0, 0, 0, 0], sizes = [4, 4, 4, 64], strides = [1, 1, 1, 1]} : vector<4x5x5x64xf32> to vector<4x4x4x64xf32>
    %3 = vector.extract_strided_slice %1 {offsets = [0, 0, 1, 0], sizes = [4, 4, 4, 64], strides = [1, 1, 1, 1]} : vector<4x5x5x64xf32> to vector<4x4x4x64xf32>
    %4 = vector.extract_strided_slice %1 {offsets = [0, 1, 0, 0], sizes = [4, 4, 4, 64], strides = [1, 1, 1, 1]} : vector<4x5x5x64xf32> to vector<4x4x4x64xf32>
    %5 = vector.extract_strided_slice %1 {offsets = [0, 1, 1, 0], sizes = [4, 4, 4, 64], strides = [1, 1, 1, 1]} : vector<4x5x5x64xf32> to vector<4x4x4x64xf32>
    %6 = tpu.concatenate %2, %3, %4, %5 in 3 : vector<4x4x4x64xf32>, vector<4x4x4x64xf32>, vector<4x4x4x64xf32>, vector<4x4x4x64xf32> -> vector<4x4x4x256xf32>
    %7 = vector.shape_cast %6 : vector<4x4x4x256xf32> to vector<64x256xf32>
    %8 = arith.truncf %7 : vector<64x256xf32> to vector<64x256xbf16>
    %c0_3 = arith.constant 0 : index
    %c0_4 = arith.constant 0 : index
    %9 = vector.load %arg2[%c0_3, %c0_4] : memref<256x16xbf16, #tpu.memory_space<vmem>>, vector<256x16xbf16>
    %cst = arith.constant dense<0.000000e+00> : vector<64x16xf32>
    %10 = tpu.matmul %8, %9, %cst {dimension_numbers = #tpu.dot_dimension_numbers<[1], [0], [0], [1], [0, 0, 1, 1], [], []>} : vector<64x256xbf16>, vector<256x16xbf16>, vector<64x16xf32> -> vector<64x16xf32>
    %c0_5 = arith.constant 0 : index
    %c0_6 = arith.constant 0 : index
    %11 = vector.load %arg3[%c0_5, %c0_6] : memref<1x16xf32, #tpu.memory_space<vmem>>, vector<1x16xf32>
    %12 = vector.broadcast %11 : vector<1x16xf32> to vector<64x16xf32>
    %13 = arith.addf %10, %12 : vector<64x16xf32>
    %cst_7 = arith.constant 0.000000e+00 : f32
    %14 = vector.broadcast %cst_7 : f32 to vector<64x16xf32>
    %15 = arith.maximumf %13, %14 : vector<64x16xf32>
    %16 = tpu.transpose %15, [1, 0] : vector<64x16xf32> -> vector<16x64xf32>
    %17 = arith.truncf %16 : vector<16x64xf32> to vector<16x64xbf16>
    %c0_8 = arith.constant 0 : index
    %c0_9 = arith.constant 0 : index
    %c0_10 = arith.constant 0 : index
    %18 = vector.load %arg4[%c0_8, %c0_9, %c0_10] : memref<1x16x64xbf16, #tpu.memory_space<vmem>>, vector<1x16x64xbf16>
    %19 = vector.shape_cast %18 : vector<1x16x64xbf16> to vector<16x64xbf16>
    %20 = vector.shape_cast %17 : vector<16x64xbf16> to vector<1x16x64xbf16>
    tpu.vector_store %arg4[%c0_8, %c0_9, %c0_10], %20 {strides = array<i32>} : memref<1x16x64xbf16, #tpu.memory_space<vmem>>, vector<1x16x64xbf16>,
    return
  }
  func.func @transform_0(%arg0: i32) -> (i32, i32, i32, i32) {
    %c0_i32 = arith.constant 0 : i32
    %c0_i32_0 = arith.constant 0 : i32
    %c0_i32_1 = arith.constant 0 : i32
    %c0_i32_2 = arith.constant 0 : i32
    return %arg0, %c0_i32, %c0_i32_0, %c0_i32_1 : i32, i32, i32, i32
  }
  func.func @transform_1(%arg0: i32) -> (i32, i32) {
    %c0_i32 = arith.constant 0 : i32
    %c0_i32_0 = arith.constant 0 : i32
    %c0_i32_1 = arith.constant 0 : i32
    return %c0_i32, %c0_i32_0 : i32, i32
  }
  func.func @transform_2(%arg0: i32) -> (i32, i32) {
    %c0_i32 = arith.constant 0 : i32
    %c0_i32_0 = arith.constant 0 : i32
    %c0_i32_1 = arith.constant 0 : i32
    return %c0_i32, %c0_i32_0 : i32, i32
  }
  func.func @transform_3(%arg0: i32) -> (i32, i32, i32) {
    %c0_i32 = arith.constant 0 : i32
    %c0_i32_0 = arith.constant 0 : i32
    %c0_i32_1 = arith.constant 0 : i32
    return %arg0, %c0_i32, %c0_i32_0 : i32, i32, i32
  }
}

module attributes {stable_mosaic.version = 11 : i64} {
  func.func @_fused_l34_kernel(%arg0: i32, %arg1: memref<4x3x3x64xbf16, #tpu.memory_space<vmem>>, %arg2: memref<256x32xbf16, #tpu.memory_space<vmem>>, %arg3: memref<1x32xf32, #tpu.memory_space<vmem>>, %arg4: memref<288x32xbf16, #tpu.memory_space<vmem>>, %arg5: memref<1x32xf32, #tpu.memory_space<vmem>>, %arg6: memref<1x32x16xf32, #tpu.memory_space<vmem>>, %arg7: memref<4x4x4x32xf32, #tpu.memory_space<vmem>>) attributes {dimension_semantics = [#tpu.dimension_semantics<parallel>], iteration_bounds = array<i64: 2>, scalar_prefetch = 0 : i64, scratch_operands = 1 : i64, tpu.core_type = #tpu.core_type<tc>, window_params = [{transform_indices = @transform_0, window_bounds = array<i64: 4, 3, 3, 64>}, {pipeline_mode = #tpu.pipeline_mode<synchronous>, transform_indices = @transform_1, window_bounds = array<i64: 256, 32>}, {pipeline_mode = #tpu.pipeline_mode<synchronous>, transform_indices = @transform_2, window_bounds = array<i64: 1, 32>}, {pipeline_mode = #tpu.pipeline_mode<synchronous>, transform_indices = @transform_3, window_bounds = array<i64: 288, 32>}, {pipeline_mode = #tpu.pipeline_mode<synchronous>, transform_indices = @transform_4, window_bounds = array<i64: 1, 32>}, {transform_indices = @transform_5, window_bounds = array<i64: 1, 32, 16>}]} {
    %c0 = arith.constant 0 : index
    %c0_0 = arith.constant 0 : index
    %c0_1 = arith.constant 0 : index
    %c0_2 = arith.constant 0 : index
    %0 = vector.load %arg1[%c0, %c0_0, %c0_1, %c0_2] : memref<4x3x3x64xbf16, #tpu.memory_space<vmem>>, vector<4x3x3x64xbf16>
    %1 = arith.extf %0 : vector<4x3x3x64xbf16> to vector<4x3x3x64xf32>
    %2 = vector.extract_strided_slice %1 {offsets = [0, 0, 0, 0], sizes = [4, 2, 2, 64], strides = [1, 1, 1, 1]} : vector<4x3x3x64xf32> to vector<4x2x2x64xf32>
    %3 = vector.extract_strided_slice %1 {offsets = [0, 0, 1, 0], sizes = [4, 2, 2, 64], strides = [1, 1, 1, 1]} : vector<4x3x3x64xf32> to vector<4x2x2x64xf32>
    %4 = vector.extract_strided_slice %1 {offsets = [0, 1, 0, 0], sizes = [4, 2, 2, 64], strides = [1, 1, 1, 1]} : vector<4x3x3x64xf32> to vector<4x2x2x64xf32>
    %5 = vector.extract_strided_slice %1 {offsets = [0, 1, 1, 0], sizes = [4, 2, 2, 64], strides = [1, 1, 1, 1]} : vector<4x3x3x64xf32> to vector<4x2x2x64xf32>
    %6 = tpu.concatenate %2, %3, %4, %5 in 3 : vector<4x2x2x64xf32>, vector<4x2x2x64xf32>, vector<4x2x2x64xf32>, vector<4x2x2x64xf32> -> vector<4x2x2x256xf32>
    %7 = vector.shape_cast %6 : vector<4x2x2x256xf32> to vector<16x256xf32>
    %8 = arith.truncf %7 : vector<16x256xf32> to vector<16x256xbf16>
    %c0_3 = arith.constant 0 : index
    %c0_4 = arith.constant 0 : index
    %9 = vector.load %arg2[%c0_3, %c0_4] : memref<256x32xbf16, #tpu.memory_space<vmem>>, vector<256x32xbf16>
    %cst = arith.constant dense<0.000000e+00> : vector<16x32xf32>
    %10 = tpu.matmul %8, %9, %cst {dimension_numbers = #tpu.dot_dimension_numbers<[1], [0], [0], [1], [0, 0, 1, 1], [], []>} : vector<16x256xbf16>, vector<256x32xbf16>, vector<16x32xf32> -> vector<16x32xf32>
    %c0_5 = arith.constant 0 : index
    %c0_6 = arith.constant 0 : index
    %11 = vector.load %arg3[%c0_5, %c0_6] : memref<1x32xf32, #tpu.memory_space<vmem>>, vector<1x32xf32>
    %12 = vector.broadcast %11 : vector<1x32xf32> to vector<16x32xf32>
    %13 = arith.addf %10, %12 : vector<16x32xf32>
    %cst_7 = arith.constant 0.000000e+00 : f32
    %14 = vector.broadcast %cst_7 : f32 to vector<16x32xf32>
    %15 = arith.maximumf %13, %14 : vector<16x32xf32>
    %cst_8 = arith.constant 0.000000e+00 : f32
    %16 = vector.broadcast %cst_8 : f32 to vector<4x1x4x32xf32>
    %c0_9 = arith.constant 0 : index
    %c0_10 = arith.constant 0 : index
    %c0_11 = arith.constant 0 : index
    %c0_12 = arith.constant 0 : index
    %17 = vector.load %arg7[%c0_9, %c0_10, %c0_11, %c0_12] : memref<4x4x4x32xf32, #tpu.memory_space<vmem>>, vector<4x1x4x32xf32>
    tpu.vector_store %arg7[%c0_9, %c0_10, %c0_11, %c0_12], %16 {strides = array<i32>} : memref<4x4x4x32xf32, #tpu.memory_space<vmem>>, vector<4x1x4x32xf32>,
    %c0_13 = arith.constant 0 : index
    %c3 = arith.constant 3 : index
    %c0_14 = arith.constant 0 : index
    %c0_15 = arith.constant 0 : index
    %18 = vector.load %arg7[%c0_13, %c3, %c0_14, %c0_15] : memref<4x4x4x32xf32, #tpu.memory_space<vmem>>, vector<4x1x4x32xf32>
    tpu.vector_store %arg7[%c0_13, %c3, %c0_14, %c0_15], %16 {strides = array<i32>} : memref<4x4x4x32xf32, #tpu.memory_space<vmem>>, vector<4x1x4x32xf32>,
    %cst_16 = arith.constant 0.000000e+00 : f32
    %19 = vector.broadcast %cst_16 : f32 to vector<4x4x1x32xf32>
    %c0_17 = arith.constant 0 : index
    %c0_18 = arith.constant 0 : index
    %c0_19 = arith.constant 0 : index
    %c0_20 = arith.constant 0 : index
    %20 = vector.load %arg7[%c0_17, %c0_18, %c0_19, %c0_20] : memref<4x4x4x32xf32, #tpu.memory_space<vmem>>, vector<4x4x1x32xf32>
    tpu.vector_store %arg7[%c0_17, %c0_18, %c0_19, %c0_20], %19 {strides = array<i32>} : memref<4x4x4x32xf32, #tpu.memory_space<vmem>>, vector<4x4x1x32xf32>,
    %c0_21 = arith.constant 0 : index
    %c0_22 = arith.constant 0 : index
    %c3_23 = arith.constant 3 : index
    %c0_24 = arith.constant 0 : index
    %21 = vector.load %arg7[%c0_21, %c0_22, %c3_23, %c0_24] : memref<4x4x4x32xf32, #tpu.memory_space<vmem>>, vector<4x4x1x32xf32>
    tpu.vector_store %arg7[%c0_21, %c0_22, %c3_23, %c0_24], %19 {strides = array<i32>} : memref<4x4x4x32xf32, #tpu.memory_space<vmem>>, vector<4x4x1x32xf32>,
    %22 = vector.shape_cast %15 : vector<16x32xf32> to vector<4x2x2x32xf32>
    %c0_25 = arith.constant 0 : index
    %c1 = arith.constant 1 : index
    %c1_26 = arith.constant 1 : index
    %c0_27 = arith.constant 0 : index
    %23 = vector.load %arg7[%c0_25, %c1, %c1_26, %c0_27] : memref<4x4x4x32xf32, #tpu.memory_space<vmem>>, vector<4x2x2x32xf32>
    tpu.vector_store %arg7[%c0_25, %c1, %c1_26, %c0_27], %22 {strides = array<i32>} : memref<4x4x4x32xf32, #tpu.memory_space<vmem>>, vector<4x2x2x32xf32>,
    %c0_28 = arith.constant 0 : index
    %c0_29 = arith.constant 0 : index
    %c0_30 = arith.constant 0 : index
    %c0_31 = arith.constant 0 : index
    %24 = vector.load %arg7[%c0_28, %c0_29, %c0_30, %c0_31] : memref<4x4x4x32xf32, #tpu.memory_space<vmem>>, vector<4x4x4x32xf32>
    %25 = vector.extract_strided_slice %24 {offsets = [0, 0, 0, 0], sizes = [4, 2, 2, 32], strides = [1, 1, 1, 1]} : vector<4x4x4x32xf32> to vector<4x2x2x32xf32>
    %26 = vector.extract_strided_slice %24 {offsets = [0, 0, 1, 0], sizes = [4, 2, 2, 32], strides = [1, 1, 1, 1]} : vector<4x4x4x32xf32> to vector<4x2x2x32xf32>
    %27 = vector.extract_strided_slice %24 {offsets = [0, 0, 2, 0], sizes = [4, 2, 2, 32], strides = [1, 1, 1, 1]} : vector<4x4x4x32xf32> to vector<4x2x2x32xf32>
    %28 = vector.extract_strided_slice %24 {offsets = [0, 1, 0, 0], sizes = [4, 2, 2, 32], strides = [1, 1, 1, 1]} : vector<4x4x4x32xf32> to vector<4x2x2x32xf32>
    %29 = vector.extract_strided_slice %24 {offsets = [0, 1, 1, 0], sizes = [4, 2, 2, 32], strides = [1, 1, 1, 1]} : vector<4x4x4x32xf32> to vector<4x2x2x32xf32>
    %30 = vector.extract_strided_slice %24 {offsets = [0, 1, 2, 0], sizes = [4, 2, 2, 32], strides = [1, 1, 1, 1]} : vector<4x4x4x32xf32> to vector<4x2x2x32xf32>
    %31 = vector.extract_strided_slice %24 {offsets = [0, 2, 0, 0], sizes = [4, 2, 2, 32], strides = [1, 1, 1, 1]} : vector<4x4x4x32xf32> to vector<4x2x2x32xf32>
    %32 = vector.extract_strided_slice %24 {offsets = [0, 2, 1, 0], sizes = [4, 2, 2, 32], strides = [1, 1, 1, 1]} : vector<4x4x4x32xf32> to vector<4x2x2x32xf32>
    %33 = vector.extract_strided_slice %24 {offsets = [0, 2, 2, 0], sizes = [4, 2, 2, 32], strides = [1, 1, 1, 1]} : vector<4x4x4x32xf32> to vector<4x2x2x32xf32>
    %34 = tpu.concatenate %25, %26, %27, %28, %29, %30, %31, %32, %33 in 3 : vector<4x2x2x32xf32>, vector<4x2x2x32xf32>, vector<4x2x2x32xf32>, vector<4x2x2x32xf32>, vector<4x2x2x32xf32>, vector<4x2x2x32xf32>, vector<4x2x2x32xf32>, vector<4x2x2x32xf32>, vector<4x2x2x32xf32> -> vector<4x2x2x288xf32>
    %35 = vector.shape_cast %34 : vector<4x2x2x288xf32> to vector<16x288xf32>
    %36 = arith.truncf %35 : vector<16x288xf32> to vector<16x288xbf16>
    %c0_32 = arith.constant 0 : index
    %c0_33 = arith.constant 0 : index
    %37 = vector.load %arg4[%c0_32, %c0_33] : memref<288x32xbf16, #tpu.memory_space<vmem>>, vector<288x32xbf16>
    %cst_34 = arith.constant dense<0.000000e+00> : vector<16x32xf32>
    %38 = tpu.matmul %36, %37, %cst_34 {dimension_numbers = #tpu.dot_dimension_numbers<[1], [0], [0], [1], [0, 0, 1, 1], [], []>} : vector<16x288xbf16>, vector<288x32xbf16>, vector<16x32xf32> -> vector<16x32xf32>
    %c0_35 = arith.constant 0 : index
    %c0_36 = arith.constant 0 : index
    %39 = vector.load %arg5[%c0_35, %c0_36] : memref<1x32xf32, #tpu.memory_space<vmem>>, vector<1x32xf32>
    %40 = vector.broadcast %39 : vector<1x32xf32> to vector<16x32xf32>
    %41 = arith.addf %38, %40 : vector<16x32xf32>
    %cst_37 = arith.constant 0.000000e+00 : f32
    %42 = vector.broadcast %cst_37 : f32 to vector<16x32xf32>
    %43 = arith.maximumf %41, %42 : vector<16x32xf32>
    %44 = tpu.transpose %43, [1, 0] : vector<16x32xf32> -> vector<32x16xf32>
    %c0_38 = arith.constant 0 : index
    %c0_39 = arith.constant 0 : index
    %c0_40 = arith.constant 0 : index
    %45 = vector.load %arg6[%c0_38, %c0_39, %c0_40] : memref<1x32x16xf32, #tpu.memory_space<vmem>>, vector<1x32x16xf32>
    %46 = vector.shape_cast %45 : vector<1x32x16xf32> to vector<32x16xf32>
    %47 = vector.shape_cast %44 : vector<32x16xf32> to vector<1x32x16xf32>
    tpu.vector_store %arg6[%c0_38, %c0_39, %c0_40], %47 {strides = array<i32>} : memref<1x32x16xf32, #tpu.memory_space<vmem>>, vector<1x32x16xf32>,
    return
  }
  func.func @transform_0(%arg0: i32) -> (i32, i32, i32, i32) {
    %c0_i32 = arith.constant 0 : i32
    %c0_i32_0 = arith.constant 0 : i32
    %c0_i32_1 = arith.constant 0 : i32
    %c0_i32_2 = arith.constant 0 : i32
    return %arg0, %c0_i32, %c0_i32_0, %c0_i32_1 : i32, i32, i32, i32
  }
  func.func @transform_1(%arg0: i32) -> (i32, i32) {
    %c0_i32 = arith.constant 0 : i32
    %c0_i32_0 = arith.constant 0 : i32
    %c0_i32_1 = arith.constant 0 : i32
    return %c0_i32, %c0_i32_0 : i32, i32
  }
  func.func @transform_2(%arg0: i32) -> (i32, i32) {
    %c0_i32 = arith.constant 0 : i32
    %c0_i32_0 = arith.constant 0 : i32
    %c0_i32_1 = arith.constant 0 : i32
    return %c0_i32, %c0_i32_0 : i32, i32
  }
  func.func @transform_3(%arg0: i32) -> (i32, i32) {
    %c0_i32 = arith.constant 0 : i32
    %c0_i32_0 = arith.constant 0 : i32
    %c0_i32_1 = arith.constant 0 : i32
    return %c0_i32, %c0_i32_0 : i32, i32
  }
  func.func @transform_4(%arg0: i32) -> (i32, i32) {
    %c0_i32 = arith.constant 0 : i32
    %c0_i32_0 = arith.constant 0 : i32
    %c0_i32_1 = arith.constant 0 : i32
    return %c0_i32, %c0_i32_0 : i32, i32
  }
  func.func @transform_5(%arg0: i32) -> (i32, i32, i32) {
    %c0_i32 = arith.constant 0 : i32
    %c0_i32_0 = arith.constant 0 : i32
    %c0_i32_1 = arith.constant 0 : i32
    return %arg0, %c0_i32, %c0_i32_0 : i32, i32, i32
  }
}

</mosaic_0001>

<bundles_post_ra>
// kernel: convnet_encoder2.3
= control target key start
LH: loop header
LB: loop body
LE: loop exit
PB: predicated region body
PF: predicated region fallthrough
CT: control target
= control target key end

     0   :  { %s1753_s12 = smov 0   ;;  %s2354_s0 = inlined_call_operand.vmem [shape: bf16[8,9,9,16], index: 0, kind: input, shape index: {}]   ;;  %s2355_s1 = inlined_call_operand.vmem [shape: bf16[64,16], index: 1, kind: input, shape index: {}]   ;;  %s2356_s2 = inlined_call_operand.vmem [shape: f32[1,16], index: 2, kind: input, shape index: {}]   ;;  %s2357_s3 = inlined_call_operand.vmem [shape: bf16[2,16,256], index: 3, kind: output, shape index: {}]  }
   0x1 LB: > { %s1759_s13 = sadd.s32 4294967295, %s1728_s12   ;;  %p1323_p0 = scmp.ge.s32.totalorder %s1728_s12, 1  ;;  %s1728_s12 = sphi %s1753_s12, %s13_s12  }
   0x2   : > { %p139_p1 = scmp.lt.s32.totalorder %s1728_s12, 3 }
   0x4   : > { %p140_p2 = pnand %p1323_p0, %p139_p1 }
   0x6   : > { %143 = sbr.rel (%p140_p2) target bundleno = 522 (0x20a), region = 32 }
   0xb   : > { %s1324_s14 = sshll.u32 %s1759_s13, 2  ;;  %vm385_vm0 = vcmask 1046528   ;;  %v1718_v0 = vld [vmem:[%s2355_s1 + $0x18] sm:$0xff]   ;;  %s1730_s21 = smov 32   ;;  %v1719_v36 = vld [vmem:[%s2355_s1 + $0x10] sm:$0xff]   ;;  %v1720_v47 = vld [vmem:[%s2355_s1 + $0x8] sm:$0xff]  }
   0xc   : > { %p165_p3 = scmp.lt.s32.totalorder %s1324_s14, 7  ;;  %1376 = vmatprep.subr.bf16.mxu0 %v1718_v0  ;;  %1416 = vmatprep.subr.bf16.mxu1 %v1718_v0  ;;  %s1731_s26 = smov 16   ;;  %vm790_vm1 = vcmask 130048   ;;  %vm823_vm2 = vcmask 261120   ;;  %vm856_vm3 = vcmask 392192   ;;  %vm944_vm4 = vcmask 523264  }
   0xd   : > { %1377 = vmatpush3.bf16.msra.mxu0 %v1718_v0  ;;  %1420 = vmatpush3.bf16.msra.mxu1 %v1718_v0  ;;  %s1732_s29 = smov 48   ;;  %p171_p4 = scmp.lt.s32.totalorder %s1759_s13, 1 }
   0xe   : > { %s2380_s14 = smov (!%p165_p3, %s1324_s14), 7  ;;  %1378 = vmatprep.subr.bf16.mxu0 %v1719_v36  ;;  %1417 = vmatprep.subr.bf16.mxu1 %v1719_v36 }
   0xf   : > { %s1424_s15 = smul.u32 72, %s2380_s14  ;;  %s2382_s13 = smov (!%p171_p4, %s1759_s13), 1 }
  0x10   : > { %s1353_s5 = sshll.u32 %s2382_s13, 4 }
  0x11   : > { %s1767_s18 = scalar_lea.vmem %s2354_s0, %s1424_s15  ;;  %1379 = vmatpush3.bf16.msra.mxu0 %v1719_v36  ;;  %1421 = vmatpush3.bf16.msra.mxu1 %v1719_v36  ;;  %s175_s8 = scalar_lea.vmem %s2357_s3, %s1353_s5 }
  0x12   : > { %v215_v1 = vld [vmem:[%s1767_s18 + $0x98] ss:$8 sps:$4 sm:$0xff]   ;;  %v179_v2 = vld [vmem:[%s1767_s18 + $0x8] ss:$8 sps:$4 sm:$0xff]   ;;  %v182_v9 = vld [vmem:[%s1767_s18 + $0x14] sm:$0x1]  ;;  %1380 = vmatprep.subr.bf16.mxu0 %v1720_v47  ;;  %1418 = vmatprep.subr.bf16.mxu1 %v1720_v47 }
  0x13   : > { %v219_v3 = vld [vmem:[%s1767_s18 + $0xa8] ss:$8 sps:$4 sm:$0xff]   ;;  %v1775_v4 = vunpack.c.l.bf16 %v215_v1  ;;  %v1777_v5 = vunpack.c.h.bf16 %v215_v1  ;;  %v1779_v6 = vunpack.c.l.bf16 %v179_v2  ;;  %v1781_v7 = vunpack.c.h.bf16 %v179_v2  ;;  %v183_v8 = vld [vmem:[%s1767_s18 + $0x18] ss:$8 sps:$4 sm:$0xff]   ;;  %v184_v10 = vld [vmem:[%s1767_s18 + $0x1c] sm:$0x1] }
  0x14   : > { %v1786_v11 = vunpack.c.l.bf16 %v219_v3  ;;  %v1788_v12 = vunpack.c.h.bf16 %v219_v3  ;;  %v1790_v13 = vunpack.c.l.bf16 %v183_v8  ;;  %v1792_v14 = vunpack.c.h.bf16 %v183_v8  ;;  %v1795_v15 = vld [vmem:[%s1767_s18] ss:$144 sps:$4 sm:$0xff]   ;;  %v178_v16 = vld [vmem:[%s1767_s18 + $0x4] sm:$0x1]  ;;  %v180_v21 = vld [vmem:[%s1767_s18 + $0xc] sm:$0x1] }
  0x15   : > { %v1441_v17 = vpack.i.bf16 %v1777_v5, %v1775_v4  ;;  %v1436_v18 = vpack.i.bf16 %v1781_v7, %v1779_v6  ;;  %v254_v19 = vunpack.c.l.bf16 %v182_v9  ;;  %v256_v20 = vunpack.c.l.bf16 %v184_v10  ;;  %v218_v22 = vld [vmem:[%s1767_s18 + $0xa4] sm:$0x1]  ;;  %v220_v23 = vld [vmem:[%s1767_s18 + $0xac] sm:$0x1]  ;;  %v214_v41 = vld [vmem:[%s1767_s18 + $0x94] sm:$0x1]  ;;  %1381 = vmatpush3.bf16.msra.mxu0 %v1720_v47  ;;  %1422 = vmatpush3.bf16.msra.mxu1 %v1720_v47 }
  0x16   : > { %v1451_v24 = vpack.i.bf16 %v1788_v12, %v1786_v11  ;;  %v1446_v25 = vpack.i.bf16 %v1792_v14, %v1790_v13  ;;  %v392_v26 = vrot.slane %v1781_v7, 1  ;;  %v395_v27 = vrot.slane %v1790_v13, 1  ;;  %v216_v42 = vld [vmem:[%s1767_s18 + $0x9c] sm:$0x1]  ;;  %v222_v56 = vld [vmem:[%s1767_s18 + $0xb4] sm:$0x1] }
  0x17   : > { %1442 = vrot.lane.b32.xlu1 %v1441_v17, %s1730_s21  ;;  %1437 = vrot.lane.b32.xlu0 %v1436_v18, %s1730_s21  ;;  %v393_v28 = vrot.slane %v254_v19, 1  ;;  %v396_v29 = vrot.slane %v256_v20, 1  ;;  %v2361_v30 = vunpack.c.l.bf16 %v1795_v15  ;;  %v250_v31 = vunpack.c.l.bf16 %v178_v16  ;;  %v186_v57 = vld [vmem:[%s1767_s18 + $0x24] sm:$0x1]  ;;  %v223_v62 = vld [vmem:[%s1767_s18 + $0x28] ss:$144 sps:$4 sm:$0xff]  }
  0x18   : > { %v252_v32 = vunpack.c.l.bf16 %v180_v21  ;;  %v389_v33 = vrot.slane %v1779_v6, 1  ;;  %v290_v34 = vunpack.c.l.bf16 %v218_v22  ;;  %v292_v35 = vunpack.c.l.bf16 %v220_v23  ;;  %v224_v63 = vld [vmem:[%s1767_s18 + $0xbc] sm:$0x1]  ;;  %v188_v16 = vld [vmem:[%s1767_s18 + $0x2c] sm:$0x1] }
  0x19   : > { %v1819_v37 = vsel %vm385_vm0, %v392_v26, %v393_v28  ;;  %v1822_v38 = vsel %vm385_vm0, %v395_v27, %v396_v29  ;;  %v386_v39 = vrot.slane %v2361_v30, 1  ;;  %v387_v40 = vrot.slane %v250_v31, 1  ;;  %v225_v21 = vld [vmem:[%s1767_s18 + $0xc0] ss:$8 sps:$4 sm:$0xff]   ;;  %v226_v22 = vld [vmem:[%s1767_s18 + $0xc4] sm:$0x1] }
  0x1a   : > { %v1466_v43 = vpack.i.bf16 %v1822_v38, %v1819_v37  ;;  %v390_v44 = vrot.slane %v252_v32, 1  ;;  %v440_v45 = vrot.slane %v1777_v5, 1  ;;  %v441_v46 = vrot.slane %v290_v34, 1  ;;  %v228_v29 = vld [vmem:[%s1767_s18 + $0xcc] sm:$0x1] }
  0x1b   : > { %1452 = vrot.lane.b32.xlu1 %v1451_v24, %s1730_s21  ;;  %1447 = vrot.lane.b32.xlu0 %v1446_v25, %s1730_s21  ;;  %v388_v48 = vsel %vm385_vm0, %v386_v39, %v387_v40  ;;  %v443_v49 = vrot.slane %v1786_v11, 1  ;;  %v444_v50 = vrot.slane %v292_v35, 1  ;;  %v2360_v51 = vunpack.c.h.bf16 %v1795_v15  ;;  %v189_v35 = vld [vmem:[%s1767_s18 + $0x30] ss:$8 sps:$4 sm:$0xff]   ;;  %v190_v36 = vld [vmem:[%s1767_s18 + $0x34] sm:$0x1] }
  0x1c   : > { %v1840_v52 = vsel %vm385_vm0, %v389_v33, %v390_v44  ;;  %v1843_v53 = vsel %vm385_vm0, %v440_v45, %v441_v46  ;;  %v286_v54 = vunpack.c.l.bf16 %v214_v41  ;;  %v288_v55 = vunpack.c.l.bf16 %v216_v42  ;;  %v1721_v42 = vld [vmem:[%s2355_s1] sm:$0xff]   ;;  %v192_v47 = vld [vmem:[%s1767_s18 + $0x3c] sm:$0x1] }
  0x1d   : > { %v1456_v58 = vpack.i.bf16 %v1840_v52, %v388_v48  ;;  %v1849_v59 = vsel %vm385_vm0, %v443_v49, %v444_v50  ;;  %v434_v60 = vrot.slane %v2360_v51, 1  ;;  %v437_v61 = vrot.slane %v1775_v4, 1  ;;  %1382 = vmatprep.subr.bf16.mxu0 %v1721_v42  ;;  %1419 = vmatprep.subr.bf16.mxu1 %v1721_v42 }
  0x1e   : > { %v1471_v0 = vpack.i.bf16 %v1849_v59, %v1843_v53  ;;  %v435_v1 = vrot.slane %v286_v54, 1  ;;  %v438_v2 = vrot.slane %v288_v55, 1  ;;  %v294_v3 = vunpack.c.l.bf16 %v222_v56  ;;  %1383 = vmatpush3.bf16.msra.mxu0 %v1721_v42  ;;  %1423 = vmatpush3.bf16.msra.mxu1 %v1721_v42 }
  0x1f   : > { %1467 = vrot.lane.b32.xlu1 %v1466_v43, %s1731_s26  ;;  %1457 = vrot.lane.b32.xlu0 %v1456_v58, %s1731_s26  ;;  %v446_v8 = vrot.slane %v1788_v12, 1  ;;  %v258_v9 = vunpack.c.l.bf16 %v186_v57  ;;  %v398_v10 = vrot.slane %v1792_v14, 1  ;;  %v1865_v19 = vunpack.c.h.bf16 %v223_v62 }
  0x20   : > { %v436_v17 = vsel %vm385_vm0, %v434_v60, %v435_v1  ;;  %v439_v18 = vsel %vm385_vm0, %v437_v61, %v438_v2  ;;  %v296_v20 = vunpack.c.l.bf16 %v224_v63  ;;  %v447_v24 = vrot.slane %v294_v3, 1  ;;  %v230_v2 = vld [vmem:[%s1767_s18 + $0xd4] sm:$0x1]  ;;  %v194_v3 = vld [vmem:[%s1767_s18 + $0x44] sm:$0x1] }
  0x21   : > { %v1461_v23 = vpack.i.bf16 %v439_v18, %v436_v17  ;;  %v399_v25 = vrot.slane %v258_v9, 1  ;;  %v1476_v26 = vpack.i.bf16 %v1819_v37, %v1840_v52  ;;  %v1871_v27 = vunpack.c.l.bf16 %v223_v62  ;;  %v229_v62 = vld [vmem:[%s1767_s18 + $0x40] ss:$144 sps:$4 sm:$0xff]  }
  0x22   : > { %v260_v28 = vunpack.c.l.bf16 %v188_v16  ;;  %v1481_v31 = vpack.i.bf16 %v1843_v53, %v439_v18  ;;  %v448_v32 = vsel %vm385_vm0, %v446_v8, %v447_v24  ;;  %v1878_v33 = vunpack.c.l.bf16 %v225_v21  ;;  %v232_v16 = vld [vmem:[%s1767_s18 + $0xdc] sm:$0x1] }
  0x23   : > { %1472 = vrot.lane.b32.xlu1 %v1471_v0, %s1731_s26  ;;  %1462 = vrot.lane.b32.xlu0 %v1461_v23, %s1731_s26  ;;  %v298_v34 = vunpack.c.l.bf16 %v226_v22  ;;  %v400_v37 = vsel %vm385_vm0, %v398_v10, %v399_v25  ;;  %v449_v39 = vrot.slane %v1865_v19, 1  ;;  %v450_v40 = vrot.slane %v296_v20, 1  ;;  %v1923_v10 = vld [vmem:[%s1767_s18 + $0xd8] ss:$8 sps:$4 sm:$0xff]   ;;  %v234_v20 = vld [vmem:[%s1767_s18 + $0xe4] sm:$0x1] }
  0x24   : > { %v401_v41 = vrot.slane %v1871_v27, 1  ;;  %v1491_v43 = vpack.i.bf16 %v448_v32, %v1849_v59  ;;  %v402_v44 = vrot.slane %v260_v28, 1  ;;  %v1889_v45 = vunpack.c.h.bf16 %v225_v21  ;;  %2368 = vst [vmem:[#allocation4_spill] sm:$0xff] %v1923_v10  ;;  %v1934_v21 = vld [vmem:[%s1767_s18 + $0x48] ss:$8 sps:$4 sm:$0xff]  }
  0x25   : > { %v300_v46 = vunpack.c.l.bf16 %v228_v29  ;;  %v452_v48 = vrot.slane %v1878_v33, 1  ;;  %v453_v49 = vrot.slane %v298_v34, 1  ;;  %v1893_v50 = vunpack.c.l.bf16 %v189_v35  ;;  %2369 = vst [vmem:[#allocation5_spill] sm:$0xff] %v1934_v21  ;;  %v196_v22 = vld [vmem:[%s1767_s18 + $0x4c] sm:$0x1] }
  0x26   : > { %v262_v52 = vunpack.c.l.bf16 %v190_v36  ;;  %v1486_v53 = vpack.i.bf16 %v400_v37, %v1822_v38  ;;  %v455_v54 = vrot.slane %v1889_v45, 1  ;;  %v1899_v56 = vunpack.c.h.bf16 %v189_v35  ;;  %v198_v34 = vld [vmem:[%s1767_s18 + $0x54] sm:$0x1] }
  0x27   : > { %2366 = vst [vmem:[#allocation2_spill] sm:$0xff] %v1893_v50  ;;  %1482 = vrot.lane.b32.xlu1 %v1481_v31, %s1732_s29  ;;  %1477 = vrot.lane.b32.xlu0 %v1476_v26, %s1732_s29  ;;  %v456_v55 = vrot.slane %v300_v46, 1  ;;  %v1902_v57 = vsel %vm385_vm0, %v449_v39, %v450_v40  ;;  %v1905_v58 = vsel %vm385_vm0, %v401_v41, %v402_v44  ;;  %v264_v59 = vunpack.c.l.bf16 %v192_v47 }
  0x28   : > { %2367 = vst [vmem:[#allocation3_spill] sm:$0xff] %v1899_v56  ;;  %v404_v60 = vrot.slane %v1893_v50, 1  ;;  %v405_v38 = vrot.slane %v262_v52, 1  ;;  %v407_v61 = vrot.slane %v1899_v56, 1  ;;  %v1911_v63 = vsel %vm385_vm0, %v452_v48, %v453_v49  ;;  %v235_v49 = vld [vmem:[%s1767_s18 + $0xe8] ss:$8 sps:$4 sm:$0xff]  }
  0x29   : > { %v1914_v0 = vsel %vm385_vm0, %v455_v54, %v456_v55  ;;  %v408_v1 = vrot.slane %v264_v59, 1  ;;  %v1501_v8 = vpack.i.bf16 %v1902_v57, %v448_v32  ;;  %v1496_v9 = vpack.i.bf16 %v1905_v58, %v400_v37  ;;  %v236_v52 = vld [vmem:[%s1767_s18 + $0xec] sm:$0x1] }
  0x2a   : > { %v1927_v17 = vsel %vm385_vm0, %v404_v60, %v405_v38  ;;  %v1511_v23 = vpack.i.bf16 %v1914_v0, %v1911_v63  ;;  %v301_v24 = vunpack.c.h.bf16 %v229_v62  ;;  %v265_v25 = vunpack.c.l.bf16 %v229_v62  ;;  %v238_v60 = vld [vmem:[%s1767_s18 + $0xf4] sm:$0x1] }
  0x2b   : > { %1492 = vrot.lane.b32.xlu1 %v1491_v43, %s1732_s29  ;;  %1487 = vrot.lane.b32.xlu0 %v1486_v53, %s1732_s29  ;;  %v1930_v18 = vsel %vm385_vm0, %v407_v61, %v408_v1  ;;  %v302_v26 = vunpack.c.l.bf16 %v230_v2  ;;  %v266_v28 = vunpack.c.l.bf16 %v194_v3  ;;  %v2359_v29 = vunpack.c.l.bf16 %v1923_v10 }
  0x2c   : > { %v304_v31 = vunpack.c.l.bf16 %v232_v16  ;;  %v1941_v32 = vunpack.c.h.bf16 %v1923_v10  ;;  %v1506_v35 = vpack.i.bf16 %v1930_v18, %v1927_v17  ;;  %v306_v36 = vunpack.c.l.bf16 %v234_v20  ;;  %v199_v16 = vld [vmem:[%s1767_s18 + $0x58] ss:$8 sps:$4 sm:$0xff]   ;;  %v200_v20 = vld [vmem:[%s1767_s18 + $0x5c] sm:$0x1] }
  0x2d   : > { %v2358_v37 = vunpack.c.l.bf16 %v1934_v21  ;;  %v268_v39 = vunpack.c.l.bf16 %v196_v22  ;;  %v1521_v40 = vpack.i.bf16 %v1878_v33, %v1865_v19  ;;  %v1516_v41 = vpack.i.bf16 %v1893_v50, %v1871_v27 }
  0x2e   : > { %v688_v42 = vrot.slane %v301_v24, 1  ;;  %v682_v43 = vrot.slane %v265_v25, 1  ;;  %v689_v44 = vrot.slane %v302_v26, 1  ;;  %v683_v46 = vrot.slane %v266_v28, 1 }
  0x2f   : > { %1502 = vrot.lane.b32.xlu1 %v1501_v8, %s1731_s26  ;;  %1497 = vrot.lane.b32.xlu0 %v1496_v9, %s1731_s26  ;;  %v1954_v47 = vunpack.c.h.bf16 %v1934_v21  ;;  %v270_v48 = vunpack.c.l.bf16 %v198_v34  ;;  %v458_v53 = vrot.slane %v2359_v29, 1  ;;  %v459_v54 = vrot.slane %v304_v31, 1  ;;  %v202_v31 = vld [vmem:[%s1767_s18 + $0x64] sm:$0x1]  ;;  %v208_v29 = vld [vmem:[%s1767_s18 + $0x7c] sm:$0x1] }
  0x30   : > { %v461_v55 = vrot.slane %v1941_v32, 1  ;;  %v462_v59 = vrot.slane %v306_v36, 1  ;;  %v410_v38 = vrot.slane %v2358_v37, 1  ;;  %v411_v61 = vrot.slane %v268_v39, 1 }
  0x31   : > { %v413_v62 = vrot.slane %v1954_v47, 1  ;;  %v414_v1 = vrot.slane %v270_v48, 1  ;;  %v1531_v2 = vpack.i.bf16 %v301_v24, %v1889_v45  ;;  %v1526_v3 = vpack.i.bf16 %v265_v25, %v1899_v56 }
  0x32   : > { %v1969_v8 = vunpack.c.l.bf16 %v235_v49  ;;  %v308_v9 = vunpack.c.l.bf16 %v236_v52  ;;  %v1974_v22 = vsel %vm385_vm0, %v688_v42, %v689_v44  ;;  %v1979_v26 = vunpack.c.h.bf16 %v235_v49  ;;  %v239_v44 = vld [vmem:[%s1767_s18 + $0x68] ss:$144 sps:$4 sm:$0xff]  }
  0x33   : > { %1512 = vrot.lane.b32.xlu1 %v1511_v23, %s1731_s26  ;;  %1507 = vrot.lane.b32.xlu0 %v1506_v35, %s1731_s26  ;;  %v1977_v23 = vsel %vm385_vm0, %v682_v43, %v683_v46  ;;  %v310_v28 = vunpack.c.l.bf16 %v238_v60  ;;  %v1983_v24 = vsel %vm385_vm0, %v458_v53, %v459_v54  ;;  %v1986_v25 = vsel %vm385_vm0, %v461_v55, %v462_v59 }
  0x34   : > { %v464_v34 = vrot.slane %v1969_v8, 1  ;;  %v465_v35 = vrot.slane %v308_v9, 1  ;;  %v1992_v36 = vsel %vm385_vm0, %v410_v38, %v411_v61  ;;  %v1995_v39 = vsel %vm385_vm0, %v413_v62, %v414_v1  ;;  %v206_v1 = vld [vmem:[%s1767_s18 + $0x74] sm:$0x1]  ;;  %v243_v9 = vld [vmem:[%s1767_s18 + $0x108] ss:$8 sps:$4 sm:$0xff]  }
  0x35   : > { %v1997_v42 = vunpack.c.l.bf16 %v199_v16  ;;  %v272_v43 = vunpack.c.l.bf16 %v200_v20  ;;  %v467_v46 = vrot.slane %v1979_v26, 1  ;;  %v468_v48 = vrot.slane %v310_v28, 1 }
  0x36   : > { %v2001_v49 = vunpack.c.h.bf16 %v199_v16  ;;  %v1541_v52 = vpack.i.bf16 %v1911_v63, %v1902_v57  ;;  %v1536_v53 = vpack.i.bf16 %v1927_v17, %v1905_v58  ;;  %v1551_v54 = vpack.i.bf16 %v1974_v22, %v1914_v0  ;;  %v204_v58 = vld [vmem:[%s1767_s18 + $0x6c] sm:$0x1]  ;;  %v241_v63 = vld [vmem:[%s1767_s18 + $0x70] ss:$144 sps:$4 sm:$0xff]   ;;  %v242_v17 = vld [vmem:[%s1767_s18 + $0x104] sm:$0x1] }
  0x37   : > { %1522 = vrot.lane.b32.xlu1 %v1521_v40, %s1730_s21  ;;  %1517 = vrot.lane.b32.xlu0 %v1516_v41, %s1730_s21  ;;  %v274_v40 = vunpack.c.l.bf16 %v202_v31  ;;  %v240_v41 = vld [vmem:[%s1767_s18 + $0xfc] sm:$0x1]  ;;  %v1546_v55 = vpack.i.bf16 %v1977_v23, %v1930_v18  ;;  %v1561_v59 = vpack.i.bf16 %v1986_v25, %v1983_v24  ;;  %v2017_v38 = vsel %vm385_vm0, %v464_v34, %v465_v35 }
  0x38   : > { %v2019_v57 = vunpack.c.h.bf16 %v239_v44  ;;  %v416_v0 = vrot.slane %v1997_v42, 1  ;;  %v417_v18 = vrot.slane %v272_v43, 1  ;;  %v2027_v61 = vunpack.c.l.bf16 %v239_v44 }
  0x39   : > { %v312_v62 = vunpack.c.l.bf16 %v240_v41  ;;  %v2032_v16 = vsel %vm385_vm0, %v467_v46, %v468_v48  ;;  %v419_v20 = vrot.slane %v2001_v49, 1  ;;  %v420_v22 = vrot.slane %v274_v40, 1  ;;  %v246_v41 = vld [vmem:[%s1767_s18 + $0x114] sm:$0x1] }
  0x3a   : > { %v470_v23 = vrot.slane %v2019_v57, 1  ;;  %v422_v31 = vrot.slane %v2027_v61, 1  ;;  %v2038_v34 = vunpack.c.h.bf16 %v241_v63  ;;  %v314_v35 = vunpack.c.l.bf16 %v242_v17 }
  0x3b   : > { %1532 = vrot.lane.b32.xlu1 %v1531_v2, %s1730_s21  ;;  %1527 = vrot.lane.b32.xlu0 %v1526_v3, %s1730_s21  ;;  %v244_v2 = vld [vmem:[%s1767_s18 + $0x10c] sm:$0x1]  ;;  %v471_v28 = vrot.slane %v312_v62, 1  ;;  %v276_v3 = vunpack.c.l.bf16 %v204_v58  ;;  %v2040_v43 = vunpack.c.l.bf16 %v241_v63  ;;  %v278_v44 = vunpack.c.l.bf16 %v206_v1 }
  0x3c   : > { %v2043_v46 = vunpack.c.l.bf16 %v243_v9  ;;  %v2048_v48 = vsel %vm385_vm0, %v416_v0, %v417_v18  ;;  %v473_v58 = vrot.slane %v2038_v34, 1  ;;  %v316_v17 = vunpack.c.l.bf16 %v244_v2 }
  0x3d   : > { %v423_v40 = vrot.slane %v276_v3, 1  ;;  %v2052_v63 = vsel %vm385_vm0, %v419_v20, %v420_v22  ;;  %v474_v62 = vrot.slane %v314_v35, 1  ;;  %v425_v1 = vrot.slane %v2040_v43, 1  ;;  %v207_v3 = vld [vmem:[%s1767_s18 + $0x78] ss:$8 sps:$4 sm:$0xff]  }
  0x3e   : > { %v426_v37 = vrot.slane %v278_v44, 1  ;;  %v318_v0 = vunpack.c.l.bf16 %v246_v41  ;;  %v476_v18 = vrot.slane %v2043_v46, 1  ;;  %v477_v35 = vrot.slane %v316_v17, 1 }
  0x3f   : > { %1542 = vrot.lane.b32.xlu1 %v1541_v52, %s1732_s29  ;;  %1537 = vrot.lane.b32.xlu0 %v1536_v53, %s1732_s29  ;;  %v2056_v52 = vsel %vm385_vm0, %v470_v23, %v471_v28  ;;  %v2058_v53 = vunpack.c.h.bf16 %v243_v9  ;;  %v2064_v2 = vsel %vm385_vm0, %v422_v31, %v423_v40  ;;  %v2067_v20 = vsel %vm385_vm0, %v473_v58, %v474_v62  ;;  %v210_v23 = vld [vmem:[%s1767_s18 + $0x84] sm:$0x1]  ;;  %v2074_v28 = vld [vmem:[%s1767_s18 + $0x88] ss:$144 sps:$4 sm:$0xff]  }
  0x40   : > { %v2070_v22 = vsel %vm385_vm0, %v425_v1, %v426_v37  ;;  %v1621_v9 = vpack.i.bf16 %v2067_v20, %v2056_v52  ;;  %v480_v37 = vrot.slane %v318_v0, 1  ;;  %v2084_v41 = vsel %vm385_vm0, %v476_v18, %v477_v35  ;;  %v248_v1 = vld [vmem:[%s1767_s18 + $0x11c] sm:$0x1]  ;;  %v212_v18 = vld [vmem:[%s1767_s18 + $0x8c] sm:$0x1] }
  0x41   : > { %v1616_v31 = vpack.i.bf16 %v2070_v22, %v2064_v2  ;;  %v479_v44 = vrot.slane %v2058_v53, 1  ;;  %v2086_v40 = vunpack.c.l.bf16 %v207_v3  ;;  %v280_v58 = vunpack.c.l.bf16 %v208_v29 }
  0x42   : > { %v2088_v17 = vunpack.c.h.bf16 %v207_v3  ;;  %v319_v62 = vunpack.c.h.bf16 %v2074_v28  ;;  %v2370_v29 = vpack.i.bf16 %v1995_v39, %v1992_v36  ;;  %v1571_v3 = vpack.i.bf16 %v2032_v16, %v2017_v38 }
  0x43   : > { %1552 = vrot.lane.b32.xlu1 %v1551_v54, %s1732_s29  ;;  %1547 = vrot.lane.b32.xlu0 %v1546_v55, %s1732_s29  ;;  %v481_v54 = vsel %vm385_vm0, %v479_v44, %v480_v37  ;;  %v282_v55 = vunpack.c.l.bf16 %v210_v23  ;;  %v428_v30 = vrot.slane %v2086_v40, 1  ;;  %v429_v60 = vrot.slane %v280_v58, 1 }
  0x44   : > { %v1631_v51 = vpack.i.bf16 %v481_v54, %v2084_v41  ;;  %v431_v0 = vrot.slane %v2088_v17, 1  ;;  %v1566_v35 = vpack.i.bf16 %v2052_v63, %v2048_v48  ;;  %v691_v44 = vrot.slane %v319_v62, 1 }
  0x45   : > { %v432_v23 = vrot.slane %v282_v55, 1  ;;  %v430_v37 = vsel %vm385_vm0, %v428_v30, %v429_v60  ;;  %v283_v58 = vunpack.c.l.bf16 %v2074_v28  ;;  %v1661_v24 = vpack.i.bf16 %v2084_v41, %v2067_v20 }
  0x46   : > { %v1656_v36 = vpack.i.bf16 %v430_v37, %v2070_v22  ;;  %v1581_v30 = vpack.i.bf16 %v1969_v8, %v1941_v32  ;;  %v1576_v60 = vpack.i.bf16 %v1997_v42, %v1954_v47 }
  0x47   : > { %1562 = vrot.lane.b32.xlu1 %v1561_v59, %s1731_s26  ;;  %1557 = vrot.lane.b32.xlu0 %v2370_v29, %s1731_s26  ;;  %v320_v59 = vunpack.c.l.bf16 %v248_v1  ;;  %v433_v21 = vsel %vm385_vm0, %v431_v0, %v432_v23  ;;  %v284_v29 = vunpack.c.l.bf16 %v212_v18  ;;  %v685_v50 = vrot.slane %v283_v58, 1 }
  0x48   : > { %v1626_v10 = vpack.i.bf16 %v433_v21, %v430_v37  ;;  %v1591_v1 = vpack.i.bf16 %v2019_v57, %v1979_v26  ;;  %v1586_v0 = vpack.i.bf16 %v2027_v61, %v2001_v49 }
  0x49   : > { %v692_v56 = vrot.slane %v320_v59, 1  ;;  %v686_v20 = vrot.slane %v284_v29, 1 }
  0x4b   : > { %1572 = vrot.lane.b32.xlu1 %v1571_v3, %s1731_s26  ;;  %1567 = vrot.lane.b32.xlu0 %v1566_v35, %s1731_s26  ;;  %v693_v28 = vsel %vm385_vm0, %v691_v44, %v692_v56  ;;  %v687_v22 = vsel %vm385_vm0, %v685_v50, %v686_v20  ;;  %v1601_v56 = vpack.i.bf16 %v2017_v38, %v1986_v25 }
  0x4c   : > { %v1671_v41 = vpack.i.bf16 %v693_v28, %v481_v54  ;;  %v1666_v55 = vpack.i.bf16 %v687_v22, %v433_v21  ;;  %v1596_v50 = vpack.i.bf16 %v2048_v48, %v1995_v39  ;;  %v1611_v21 = vpack.i.bf16 %v2056_v52, %v2032_v16 }
  0x4d   : > { %v1606_v54 = vpack.i.bf16 %v2064_v2, %v2052_v63  ;;  %v1641_v25 = vpack.i.bf16 %v2043_v46, %v2038_v34  ;;  %v1636_v39 = vpack.i.bf16 %v2086_v40, %v2040_v43  ;;  %v1651_v38 = vpack.i.bf16 %v319_v62, %v2058_v53 }
  0x4e   : > { %v1646_v16 = vpack.i.bf16 %v283_v58, %v2088_v17 }
  0x4f   : > { %1582 = vrot.lane.b32.xlu1 %v1581_v30, %s1730_s21  ;;  %1577 = vrot.lane.b32.xlu0 %v1576_v60, %s1730_s21 }
  0x53   : > { %1592 = vrot.lane.b32.xlu1 %v1591_v1, %s1730_s21  ;;  %1587 = vrot.lane.b32.xlu0 %v1586_v0, %s1730_s21  ;;  %v2372_v1 = vunpack.c.h.bf16 %v1795_v15 }
  0x57   : > { %1602 = vrot.lane.b32.xlu1 %v1601_v56, %s1732_s29  ;;  %1597 = vrot.lane.b32.xlu0 %v1596_v50, %s1732_s29 }
  0x5b   : > { %1612 = vrot.lane.b32.xlu1 %v1611_v21, %s1732_s29  ;;  %1607 = vrot.lane.b32.xlu0 %v1606_v54, %s1732_s29 }
  0x5f   : > { %1622 = vrot.lane.b32.xlu1 %v1621_v9, %s1731_s26  ;;  %1617 = vrot.lane.b32.xlu0 %v1616_v31, %s1731_s26 }
  0x63   : > { %1632 = vrot.lane.b32.xlu1 %v1631_v51, %s1731_s26  ;;  %1627 = vrot.lane.b32.xlu0 %v1626_v10, %s1731_s26 }
  0x67   : > { %1642 = vrot.lane.b32.xlu1 %v1641_v25, %s1730_s21  ;;  %1637 = vrot.lane.b32.xlu0 %v1636_v39, %s1730_s21 }
  0x6b   : > { %1652 = vrot.lane.b32.xlu1 %v1651_v38, %s1730_s21  ;;  %1647 = vrot.lane.b32.xlu0 %v1646_v16, %s1730_s21 }
  0x6f   : > { %1662 = vrot.lane.b32.xlu1 %v1661_v24, %s1732_s29  ;;  %1657 = vrot.lane.b32.xlu0 %v1656_v36, %s1732_s29  ;;  %v2371_v24 = vunpack.c.l.bf16 %v1795_v15 }
  0x73   : > { %1672 = vrot.lane.b32.xlu1 %v1671_v41, %s1732_s29  ;;  %1667 = vrot.lane.b32.xlu0 %v1666_v55, %s1732_s29 }
  0x89   : > { %v1443_v51 = vpop.permute.xlu1 %1442  ;;  %v1438_v10 = vpop.permute.xlu0 %1437 }
  0x8a   : > { %v1445_v62 = vunpack.i.h.bf16 %v1443_v51  ;;  %v1444_v18 = vunpack.i.l.bf16 %v1443_v51  ;;  %v1440_v3 = vunpack.i.h.bf16 %v1438_v10  ;;  %v1439_v30 = vunpack.i.l.bf16 %v1438_v10 }
  0x8d   : > { %v1453_v48 = vpop.permute.xlu1 %1452  ;;  %v1448_v63 = vpop.permute.xlu0 %1447 }
  0x8e   : > { %v1455_v60 = vunpack.i.h.bf16 %v1453_v48  ;;  %v1454_v41 = vunpack.i.l.bf16 %v1453_v48  ;;  %v1449_v22 = vunpack.i.l.bf16 %v1448_v63 }
  0x91   : > { %v1468_v52 = vpop.permute.xlu1 %1467  ;;  %v1458_v2 = vpop.permute.xlu0 %1457 }
  0x92   : > { %v1460_v9 = vunpack.i.h.bf16 %v1458_v2  ;;  %v1459_v31 = vunpack.i.l.bf16 %v1458_v2  ;;  %v1470_v35 = vunpack.i.h.bf16 %v1468_v52  ;;  %v1469_v23 = vunpack.i.l.bf16 %v1468_v52 }
  0x94   : > { %v792_v58 = vsel %vm790_vm1, %v1779_v6, %v1460_v9  ;;  %v791_v59 = vsel %vm790_vm1, %v2371_v24, %v1459_v31  ;;  %v794_v6 = vsel %vm790_vm1, %v1790_v13, %v1470_v35  ;;  %v793_v56 = vsel %vm790_vm1, %v1781_v7, %v1469_v23 }
  0x95   : > { %v1473_v44 = vpop.permute.xlu1 %1472  ;;  %v1463_v37 = vpop.permute.xlu0 %1462  ;;  %v824_v54 = vsel %vm823_vm2, %v791_v59, %v1439_v30  ;;  %v825_v25 = vsel %vm823_vm2, %v792_v58, %v1440_v3  ;;  %v1450_v9 = vunpack.i.h.bf16 %v1448_v63  ;;  %v826_v3 = vsel %vm823_vm2, %v793_v56, %v1449_v22 }
  0x96   : > { %v1465_v36 = vunpack.i.h.bf16 %v1463_v37  ;;  %v1464_v29 = vunpack.i.l.bf16 %v1463_v37  ;;  %v1475_v20 = vunpack.i.h.bf16 %v1473_v44  ;;  %v1474_v28 = vunpack.i.l.bf16 %v1473_v44 }
  0x97   : > { %v827_v24 = vsel %vm823_vm2, %v794_v6, %v1450_v9  ;;  %v2373_v9 = vld [vmem:[#allocation3_spill] sm:$0xff] }
  0x98   : > { %v808_v55 = vsel %vm790_vm1, %v1775_v4, %v1465_v36  ;;  %v807_v0 = vsel %vm790_vm1, %v2372_v1, %v1464_v29  ;;  %v810_v15 = vsel %vm790_vm1, %v1786_v11, %v1475_v20  ;;  %v809_v51 = vsel %vm790_vm1, %v1777_v5, %v1474_v28 }
  0x99   : > { %v1483_v50 = vpop.permute.xlu1 %1482  ;;  %v1478_v21 = vpop.permute.xlu0 %1477  ;;  %v840_v13 = vsel %vm823_vm2, %v807_v0, %v1444_v18  ;;  %v841_v7 = vsel %vm823_vm2, %v808_v55, %v1445_v62  ;;  %v842_v62 = vsel %vm823_vm2, %v809_v51, %v1454_v41  ;;  %v843_v58 = vsel %vm823_vm2, %v810_v15, %v1455_v60 }
  0x9a   : > { %v1485_v39 = vunpack.i.h.bf16 %v1483_v50  ;;  %v1484_v38 = vunpack.i.l.bf16 %v1483_v50  ;;  %v1480_v16 = vunpack.i.h.bf16 %v1478_v21  ;;  %v1479_v4 = vunpack.i.l.bf16 %v1478_v21 }
  0x9c   : > { %v857_v10 = vsel %vm856_vm3, %v824_v54, %v1479_v4  ;;  %v858_v48 = vsel %vm856_vm3, %v825_v25, %v1480_v16  ;;  %v873_v52 = vsel %vm856_vm3, %v840_v13, %v1484_v38  ;;  %v874_v2 = vsel %vm856_vm3, %v841_v7, %v1485_v39 }
  0x9d   : > { %v1493_v31 = vpop.permute.xlu1 %1492  ;;  %v1488_v11 = vpop.permute.xlu0 %1487  ;;  %v889_v35 = vpack.c.bf16 %v858_v48, %v857_v10  ;;  %v897_v23 = vpack.c.bf16 %v874_v2, %v873_v52 }
  0x9e   : > { %v1495_v5 = vunpack.i.h.bf16 %v1493_v31  ;;  %v1494_v44 = vunpack.i.l.bf16 %v1493_v31  ;;  %v1490_v18 = vunpack.i.h.bf16 %v1488_v11  ;;  %v1489_v37 = vunpack.i.l.bf16 %v1488_v11 }
  0x9f   : > { %1384 = vmatprep.mubr.msk.bf16.mxu0 %vm944_vm4, %v889_v35  ;;  %1400 = vmatprep.mubr.msk.bf16.mxu1 %vm944_vm4, %v897_v23 }
  0xa0   : > { %v875_v63 = vsel %vm856_vm3, %v842_v62, %v1494_v44  ;;  %v876_v59 = vsel %vm856_vm3, %v843_v58, %v1495_v5  ;;  %v860_v36 = vsel %vm856_vm3, %v827_v24, %v1490_v18  ;;  %v859_v29 = vsel %vm856_vm3, %v826_v3, %v1489_v37 }
  0xa1   : > { %v898_v30 = vpack.c.bf16 %v876_v59, %v875_v63  ;;  %v890_v20 = vpack.c.bf16 %v860_v36, %v859_v29  ;;  %v1503_v28 = vpop.permute.xlu1 %1502  ;;  %v1498_v41 = vpop.permute.xlu0 %1497  ;;  %v2374_v36 = vld [vmem:[#allocation2_spill] sm:$0xff] }
  0xa2   : > { %v1505_v0 = vunpack.i.h.bf16 %v1503_v28  ;;  %v1504_v6 = vunpack.i.l.bf16 %v1503_v28  ;;  %v1500_v56 = vunpack.i.h.bf16 %v1498_v41  ;;  %v1499_v50 = vunpack.i.l.bf16 %v1498_v41 }
  0xa3   : > { %1385 = vmatmul.mubr.msk.bf16.vlgmr.msra.gmra.mxu0 %vm944_vm4, %v890_v20  ;;  %1401 = vmatmul.mubr.msk.bf16.vlgmr.msra.gmra.mxu1 %vm944_vm4, %v898_v30 }
  0xa4   : > { %v812_v51 = vsel %vm790_vm1, %v1865_v19, %v1505_v0  ;;  %v811_v13 = vsel %vm790_vm1, %v1788_v12, %v1504_v6  ;;  %v796_v7 = vsel %vm790_vm1, %v1871_v27, %v1500_v56  ;;  %v795_v10 = vsel %vm790_vm1, %v1792_v14, %v1499_v50 }
  0xa5   : > { %v1513_v60 = vpop.permute.xlu1 %1512  ;;  %v1508_v22 = vpop.permute.xlu0 %1507 }
  0xa6   : > { %v1515_v21 = vunpack.i.h.bf16 %v1513_v60  ;;  %v1514_v54 = vunpack.i.l.bf16 %v1513_v60  ;;  %v1510_v25 = vunpack.i.h.bf16 %v1508_v22  ;;  %v1509_v19 = vunpack.i.l.bf16 %v1508_v22 }
  0xa8   : > { %v814_v52 = vsel %vm790_vm1, %v1889_v45, %v1515_v21  ;;  %v813_v2 = vsel %vm790_vm1, %v1878_v33, %v1514_v54  ;;  %v798_v31 = vsel %vm790_vm1, %v2373_v9, %v1510_v25  ;;  %v797_v29 = vsel %vm790_vm1, %v2374_v36, %v1509_v19 }
  0xa9   : > { %v1523_v55 = vpop.permute.xlu1 %1522  ;;  %v1518_v1 = vpop.permute.xlu0 %1517 }
  0xaa   : > { %v1525_v39 = vunpack.i.h.bf16 %v1523_v55  ;;  %v1524_v38 = vunpack.i.l.bf16 %v1523_v55  ;;  %v1519_v16 = vunpack.i.l.bf16 %v1518_v1  ;;  %v1520_v48 = vunpack.i.h.bf16 %v1518_v1 }
  0xac   : > { %v844_v3 = vsel %vm823_vm2, %v811_v13, %v1524_v38  ;;  %v845_v12 = vsel %vm823_vm2, %v812_v51, %v1525_v39  ;;  %v828_v27 = vsel %vm823_vm2, %v795_v10, %v1519_v16  ;;  %v829_v18 = vsel %vm823_vm2, %v796_v7, %v1520_v48 }
  0xad   : > { %v1533_v4 = vpop.permute.xlu1 %1532  ;;  %v1528_v15 = vpop.permute.xlu0 %1527 }
  0xae   : > { %v1534_v11 = vunpack.i.l.bf16 %v1533_v4  ;;  %v1535_v33 = vunpack.i.h.bf16 %v1533_v4  ;;  %v1530_v37 = vunpack.i.h.bf16 %v1528_v15  ;;  %v1529_v62 = vunpack.i.l.bf16 %v1528_v15 }
  0xb0   : > { %v846_v30 = vsel %vm823_vm2, %v813_v2, %v1534_v11  ;;  %v847_v6 = vsel %vm823_vm2, %v814_v52, %v1535_v33  ;;  %v830_v56 = vsel %vm823_vm2, %v797_v29, %v1529_v62  ;;  %v831_v50 = vsel %vm823_vm2, %v798_v31, %v1530_v37  ;;  %v2377_v33 = vld [vmem:[#allocation5_spill] sm:$0xff] }
  0xb1   : > { %v1543_v35 = vpop.permute.xlu1 %1542  ;;  %v1538_v14 = vpop.permute.xlu0 %1537  ;;  %v2378_v37 = vunpack.c.l.bf16 %v2377_v33 }
  0xb2   : > { %v1545_v23 = vunpack.i.h.bf16 %v1543_v35  ;;  %v1544_v5 = vunpack.i.l.bf16 %v1543_v35  ;;  %v1540_v44 = vunpack.i.h.bf16 %v1538_v14  ;;  %v1539_v45 = vunpack.i.l.bf16 %v1538_v14 }
  0xb4   : > { %v877_v58 = vsel %vm856_vm3, %v844_v3, %v1544_v5  ;;  %v878_v24 = vsel %vm856_vm3, %v845_v12, %v1545_v23  ;;  %v861_v63 = vsel %vm856_vm3, %v828_v27, %v1539_v45  ;;  %v862_v59 = vsel %vm856_vm3, %v829_v18, %v1540_v44  ;;  %v2375_v5 = vld [vmem:[#allocation4_spill] sm:$0xff] }
  0xb5   : > { %v899_v20 = vpack.c.bf16 %v878_v24, %v877_v58  ;;  %v891_v28 = vpack.c.bf16 %v862_v59, %v861_v63  ;;  %v1553_v41 = vpop.permute.xlu1 %1552  ;;  %v1548_v60 = vpop.permute.xlu0 %1547  ;;  %v2376_v44 = vunpack.c.l.bf16 %v2375_v5 }
  0xb6   : > { %v1555_v22 = vunpack.i.h.bf16 %v1553_v41  ;;  %v1554_v55 = vunpack.i.l.bf16 %v1553_v41  ;;  %v1550_v1 = vunpack.i.h.bf16 %v1548_v60  ;;  %v1549_v0 = vunpack.i.l.bf16 %v1548_v60 }
  0xb7   : > { %1388 = vmatprep.mubr.msk.bf16.mxu0 %vm944_vm4, %v891_v28  ;;  %1404 = vmatprep.mubr.msk.bf16.mxu1 %vm944_vm4, %v899_v20 }
  0xb8   : > { %v879_v21 = vsel %vm856_vm3, %v846_v30, %v1554_v55  ;;  %v880_v54 = vsel %vm856_vm3, %v847_v6, %v1555_v22  ;;  %v863_v25 = vsel %vm856_vm3, %v830_v56, %v1549_v0  ;;  %v864_v39 = vsel %vm856_vm3, %v831_v50, %v1550_v1 }
  0xb9   : > { %v900_v38 = vpack.c.bf16 %v880_v54, %v879_v21  ;;  %v892_v16 = vpack.c.bf16 %v864_v39, %v863_v25  ;;  %v1563_v4 = vpop.permute.xlu1 %1562  ;;  %v1558_v15 = vpop.permute.xlu0 %1557 }
  0xba   : > { %v1565_v48 = vunpack.i.h.bf16 %v1563_v4  ;;  %v1564_v52 = vunpack.i.l.bf16 %v1563_v4  ;;  %v1560_v2 = vunpack.i.h.bf16 %v1558_v15  ;;  %v1559_v9 = vunpack.i.l.bf16 %v1558_v15 }
  0xbb   : > { %1389 = vmatmul.mubr.msk.bf16.gmra.mxu0 %vm944_vm4, %v892_v16  ;;  %1405 = vmatmul.mubr.msk.bf16.gmra.mxu1 %vm944_vm4, %v900_v38 }
  0xbc   : > { %v816_v23 = vsel %vm790_vm1, %v1941_v32, %v1565_v48  ;;  %v815_v45 = vsel %vm790_vm1, %v2376_v44, %v1564_v52  ;;  %v800_v18 = vsel %vm790_vm1, %v1954_v47, %v1560_v2  ;;  %v799_v62 = vsel %vm790_vm1, %v2378_v37, %v1559_v9 }
  0xbd   : > { %v1573_v51 = vpop.permute.xlu1 %1572  ;;  %v1568_v13 = vpop.permute.xlu0 %1567 }
  0xbe   : > { %v1575_v31 = vunpack.i.h.bf16 %v1573_v51  ;;  %v1574_v19 = vunpack.i.l.bf16 %v1573_v51  ;;  %v1570_v3 = vunpack.i.h.bf16 %v1568_v13  ;;  %v1569_v59 = vunpack.i.l.bf16 %v1568_v13 }
  0xc0   : > { %v818_v24 = vsel %vm790_vm1, %v1979_v26, %v1575_v31  ;;  %v817_v63 = vsel %vm790_vm1, %v1969_v8, %v1574_v19  ;;  %v802_v32 = vsel %vm790_vm1, %v2001_v49, %v1570_v3  ;;  %v801_v21 = vsel %vm790_vm1, %v1997_v42, %v1569_v59 }
  0xc1   : > { %v1583_v7 = vpop.permute.xlu1 %1582  ;;  %v1578_v10 = vpop.permute.xlu0 %1577 }
  0xc2   : > { %v1585_v12 = vunpack.i.h.bf16 %v1583_v7  ;;  %v1584_v27 = vunpack.i.l.bf16 %v1583_v7  ;;  %v1579_v11 = vunpack.i.l.bf16 %v1578_v10  ;;  %v1580_v58 = vunpack.i.h.bf16 %v1578_v10 }
  0xc4   : > { %v848_v36 = vsel %vm823_vm2, %v815_v45, %v1584_v27  ;;  %v849_v29 = vsel %vm823_vm2, %v816_v23, %v1585_v12  ;;  %v832_v47 = vsel %vm823_vm2, %v799_v62, %v1579_v11  ;;  %v833_v55 = vsel %vm823_vm2, %v800_v18, %v1580_v58 }
  0xc5   : > { %v1593_v35 = vpop.permute.xlu1 %1592  ;;  %v1588_v14 = vpop.permute.xlu0 %1587 }
  0xc6   : > { %v1594_v30 = vunpack.i.l.bf16 %v1593_v35  ;;  %v1595_v8 = vunpack.i.h.bf16 %v1593_v35  ;;  %v1590_v1 = vunpack.i.h.bf16 %v1588_v14  ;;  %v1589_v0 = vunpack.i.l.bf16 %v1588_v14 }
  0xc8   : > { %v850_v54 = vsel %vm823_vm2, %v817_v63, %v1594_v30  ;;  %v851_v7 = vsel %vm823_vm2, %v818_v24, %v1595_v8  ;;  %v834_v10 = vsel %vm823_vm2, %v801_v21, %v1589_v0  ;;  %v835_v48 = vsel %vm823_vm2, %v802_v32, %v1590_v1 }
  0xc9   : > { %v1603_v20 = vpop.permute.xlu1 %1602  ;;  %v1598_v28 = vpop.permute.xlu0 %1597 }
  0xca   : > { %v1605_v41 = vunpack.i.h.bf16 %v1603_v20  ;;  %v1604_v60 = vunpack.i.l.bf16 %v1603_v20  ;;  %v1600_v22 = vunpack.i.h.bf16 %v1598_v28  ;;  %v1599_v26 = vunpack.i.l.bf16 %v1598_v28 }
  0xcc   : > { %v881_v49 = vsel %vm856_vm3, %v848_v36, %v1604_v60  ;;  %v882_v6 = vsel %vm856_vm3, %v849_v29, %v1605_v41  ;;  %v865_v56 = vsel %vm856_vm3, %v832_v47, %v1599_v26  ;;  %v866_v50 = vsel %vm856_vm3, %v833_v55, %v1600_v22 }
  0xcd   : > { %v901_v25 = vpack.c.bf16 %v882_v6, %v881_v49  ;;  %v893_v39 = vpack.c.bf16 %v866_v50, %v865_v56  ;;  %v1613_v38 = vpop.permute.xlu1 %1612  ;;  %v1608_v16 = vpop.permute.xlu0 %1607 }
  0xce   : > { %v1615_v4 = vunpack.i.h.bf16 %v1613_v38  ;;  %v1614_v15 = vunpack.i.l.bf16 %v1613_v38  ;;  %v1610_v51 = vunpack.i.h.bf16 %v1608_v16  ;;  %v1609_v13 = vunpack.i.l.bf16 %v1608_v16 }
  0xcf   : > { %1392 = vmatprep.mubr.msk.bf16.mxu0 %vm944_vm4, %v893_v39  ;;  %1408 = vmatprep.mubr.msk.bf16.mxu1 %vm944_vm4, %v901_v25 }
  0xd0   : > { %v883_v42 = vsel %vm856_vm3, %v850_v54, %v1614_v15  ;;  %v884_v52 = vsel %vm856_vm3, %v851_v7, %v1615_v4  ;;  %v867_v2 = vsel %vm856_vm3, %v834_v10, %v1609_v13  ;;  %v868_v9 = vsel %vm856_vm3, %v835_v48, %v1610_v51 }
  0xd1   : > { %v902_v31 = vpack.c.bf16 %v884_v52, %v883_v42  ;;  %v894_v19 = vpack.c.bf16 %v868_v9, %v867_v2  ;;  %v1623_v3 = vpop.permute.xlu1 %1622  ;;  %v1618_v12 = vpop.permute.xlu0 %1617 }
  0xd2   : > { %v1625_v23 = vunpack.i.h.bf16 %v1623_v3  ;;  %v1624_v5 = vunpack.i.l.bf16 %v1623_v3  ;;  %v1620_v44 = vunpack.i.h.bf16 %v1618_v12  ;;  %v1619_v45 = vunpack.i.l.bf16 %v1618_v12 }
  0xd3   : > { %1393 = vmatmul.mubr.msk.bf16.gmra.mxu0 %vm944_vm4, %v894_v19  ;;  %1409 = vmatmul.mubr.msk.bf16.gmra.mxu1 %vm944_vm4, %v902_v31 }
  0xd4   : > { %v820_v59 = vsel %vm790_vm1, %v2038_v34, %v1625_v23  ;;  %v819_v36 = vsel %vm790_vm1, %v2019_v57, %v1624_v5  ;;  %v804_v29 = vsel %vm790_vm1, %v2040_v43, %v1620_v44  ;;  %v803_v47 = vsel %vm790_vm1, %v2027_v61, %v1619_v45 }
  0xd5   : > { %v1633_v27 = vpop.permute.xlu1 %1632  ;;  %v1628_v11 = vpop.permute.xlu0 %1627 }
  0xd6   : > { %v1635_v18 = vunpack.i.h.bf16 %v1633_v27  ;;  %v1634_v33 = vunpack.i.l.bf16 %v1633_v27  ;;  %v1630_v37 = vunpack.i.h.bf16 %v1628_v11  ;;  %v1629_v34 = vunpack.i.l.bf16 %v1628_v11  ;;  %v2312_v27 = vld [vmem:[%s2356_s2] ss:$0 sm:$0xff] }
  0xd8   : > { %v822_v20 = vsel %vm790_vm1, %v2058_v53, %v1635_v18  ;;  %v821_v28 = vsel %vm790_vm1, %v2043_v46, %v1634_v33  ;;  %v806_v41 = vsel %vm790_vm1, %v2088_v17, %v1630_v37  ;;  %v805_v54 = vsel %vm790_vm1, %v2086_v40, %v1629_v34 }
  0xd9   : > { %v1643_v35 = vpop.permute.xlu1 %1642  ;;  %v1638_v14 = vpop.permute.xlu0 %1637 }
  0xda   : > { %v1645_v62 = vunpack.i.h.bf16 %v1643_v35  ;;  %v1644_v58 = vunpack.i.l.bf16 %v1643_v35  ;;  %v1639_v24 = vunpack.i.l.bf16 %v1638_v14  ;;  %v1640_v30 = vunpack.i.h.bf16 %v1638_v14 }
  0xdc   : > { %v852_v60 = vsel %vm823_vm2, %v819_v36, %v1644_v58  ;;  %v853_v57 = vsel %vm823_vm2, %v820_v59, %v1645_v62  ;;  %v836_v43 = vsel %vm823_vm2, %v803_v47, %v1639_v24  ;;  %v837_v0 = vsel %vm823_vm2, %v804_v29, %v1640_v30 }
  0xdd   : > { %v1653_v63 = vpop.permute.xlu1 %1652  ;;  %v1648_v32 = vpop.permute.xlu0 %1647 }
  0xde   : > { %v1654_v22 = vunpack.i.l.bf16 %v1653_v63  ;;  %v1655_v46 = vunpack.i.h.bf16 %v1653_v63  ;;  %v1650_v49 = vunpack.i.h.bf16 %v1648_v32  ;;  %v1649_v6 = vunpack.i.l.bf16 %v1648_v32 }
  0xe0   : > { %v854_v25 = vsel %vm823_vm2, %v821_v28, %v1654_v22  ;;  %v855_v10 = vsel %vm823_vm2, %v822_v20, %v1655_v46  ;;  %v838_v48 = vsel %vm823_vm2, %v805_v54, %v1649_v6  ;;  %v839_v42 = vsel %vm823_vm2, %v806_v41, %v1650_v49 }
  0xe1   : > { %v1663_v26 = vpop.permute.xlu1 %1662  ;;  %v1658_v61 = vpop.permute.xlu0 %1657 }
  0xe2   : > { %v1665_v55 = vunpack.i.h.bf16 %v1663_v26  ;;  %v1664_v8 = vunpack.i.l.bf16 %v1663_v26  ;;  %v1660_v1 = vunpack.i.h.bf16 %v1658_v61  ;;  %v1659_v53 = vunpack.i.l.bf16 %v1658_v61 }
  0xe4   : > { %v885_v17 = vsel %vm856_vm3, %v852_v60, %v1664_v8  ;;  %v886_v56 = vsel %vm856_vm3, %v853_v57, %v1665_v55  ;;  %v869_v50 = vsel %vm856_vm3, %v836_v43, %v1659_v53  ;;  %v870_v21 = vsel %vm856_vm3, %v837_v0, %v1660_v1 }
  0xe5   : > { %v903_v39 = vpack.c.bf16 %v886_v56, %v885_v17  ;;  %v895_v38 = vpack.c.bf16 %v870_v21, %v869_v50  ;;  %v1673_v16 = vpop.permute.xlu1 %1672  ;;  %v1668_v4 = vpop.permute.xlu0 %1667 }
  0xe6   : > { %v1675_v15 = vunpack.i.h.bf16 %v1673_v16  ;;  %v1674_v51 = vunpack.i.l.bf16 %v1673_v16  ;;  %v1670_v13 = vunpack.i.h.bf16 %v1668_v4  ;;  %v1669_v7 = vunpack.i.l.bf16 %v1668_v4 }
  0xe7   : > { %1396 = vmatprep.mubr.msk.bf16.mxu0 %vm944_vm4, %v895_v38  ;;  %1412 = vmatprep.mubr.msk.bf16.mxu1 %vm944_vm4, %v903_v39 }
  0xe8   : > { %v887_v40 = vsel %vm856_vm3, %v854_v25, %v1674_v51  ;;  %v888_v52 = vsel %vm856_vm3, %v855_v10, %v1675_v15  ;;  %v871_v2 = vsel %vm856_vm3, %v838_v48, %v1669_v7  ;;  %v872_v9 = vsel %vm856_vm3, %v839_v42, %v1670_v13 }
  0xe9   : > { %v904_v31 = vpack.c.bf16 %v888_v52, %v887_v40  ;;  %v896_v19 = vpack.c.bf16 %v872_v9, %v871_v2 }
  0xeb   : > { %1397 = vmatmul.mubr.msk.bf16.gmra.mxu0 %vm944_vm4, %v896_v19  ;;  %1413 = vmatmul.mubr.msk.bf16.gmra.mxu1 %vm944_vm4, %v904_v31 }
 0x163   : > { %v1386_v3 = vpop.f32.mrf.mxu0  ;;  %v1402_v12 = vpop.f32.mrf.mxu1 }
 0x164   : > { %v1036_v33 = vadd.f32 %v1386_v3, %v2312_v27  ;;  %v1100_v58 = vadd.f32 %v1402_v12, %v2312_v27 }
 0x165   : > { %v1027_v11 = vpop.f32.mrf.mxu0  ;;  %v1091_v35 = vpop.f32.mrf.mxu1 }
 0x166   : > { %v1028_v14 = vadd.f32 %v2312_v27, %v1027_v11  ;;  %v1092_v23 = vadd.f32 %v2312_v27, %v1091_v35  ;;  %v1156_v29 = vmax.f32 %v1036_v33, 0.0  ;;  %v1172_v47 = vmax.f32 %v1100_v58, 0.0 }
 0x167   : > { %v1387_v5 = vpop.f32.mrf.mxu0  ;;  %v1403_v44 = vpop.f32.mrf.mxu1 }
 0x168   : > { %v1154_v45 = vmax.f32 %v1028_v14, 0.0  ;;  %v1170_v18 = vmax.f32 %v1092_v23, 0.0  ;;  %v1039_v30 = vadd.f32 %v1387_v5, %v2312_v27  ;;  %v1103_v20 = vadd.f32 %v1403_v44, %v2312_v27 }
 0x169   : > { %v1030_v37 = vpop.f32.mrf.mxu0  ;;  %v1094_v62 = vpop.f32.mrf.mxu1  ;;  %v1680_v41 = vpack.i.bf16 %v1172_v47, %v1156_v29 }
 0x16a   : > { %v1031_v24 = vadd.f32 %v2312_v27, %v1030_v37  ;;  %v1095_v63 = vadd.f32 %v2312_v27, %v1094_v62  ;;  %v1676_v32 = vpack.i.bf16 %v1170_v18, %v1154_v45  ;;  %v1157_v34 = vmax.f32 %v1039_v30, 0.0 }
 0x16b   : > { %v1173_v60 = vmax.f32 %v1103_v20, 0.0 }
 0x16c   : > { %v1155_v59 = vmax.f32 %v1031_v24, 0.0  ;;  %v1171_v36 = vmax.f32 %v1095_v63, 0.0  ;;  %1677 = vxpose.xlu0.b32.start [1/16] (narrow) %v1676_v32, 16 }
 0x16d   : > { %v1682_v57 = vpack.i.bf16 %v1173_v60, %v1157_v34 }
 0x16e   : > { %v1678_v28 = vpack.i.bf16 %v1171_v36, %v1155_v59 }
 0x170   : > { %1679 = vxpose.xlu0.b32.cont [2/16] (narrow) %v1678_v28, 16 }
 0x174   : > { %1681 = vxpose.xlu0.b32.cont [3/16] (narrow) %v1680_v41, 16 }
 0x178   : > { %1683 = vxpose.xlu0.b32.cont [4/16] (narrow) %v1682_v57, 16 }
 0x17b   : > { %v1390_v43 = vpop.f32.mrf.mxu0  ;;  %v1406_v22 = vpop.f32.mrf.mxu1 }
 0x17c   : > { %v1052_v49 = vadd.f32 %v1390_v43, %v2312_v27  ;;  %v1116_v56 = vadd.f32 %v1406_v22, %v2312_v27 }
 0x17d   : > { %v1043_v26 = vpop.f32.mrf.mxu0  ;;  %v1107_v61 = vpop.f32.mrf.mxu1 }
 0x17e   : > { %v1044_v55 = vadd.f32 %v2312_v27, %v1043_v26  ;;  %v1108_v8 = vadd.f32 %v2312_v27, %v1107_v61  ;;  %v1160_v38 = vmax.f32 %v1052_v49, 0.0  ;;  %v1176_v16 = vmax.f32 %v1116_v56, 0.0 }
 0x17f   : > { %v1391_v1 = vpop.f32.mrf.mxu0  ;;  %v1407_v53 = vpop.f32.mrf.mxu1 }
 0x180   : > { %v1158_v0 = vmax.f32 %v1044_v55, 0.0  ;;  %v1174_v46 = vmax.f32 %v1108_v8, 0.0  ;;  %v1055_v4 = vadd.f32 %v1391_v1, %v2312_v27  ;;  %v1119_v15 = vadd.f32 %v1407_v53, %v2312_v27 }
 0x181   : > { %v1046_v6 = vpop.f32.mrf.mxu0  ;;  %v1110_v17 = vpop.f32.mrf.mxu1  ;;  %v1688_v13 = vpack.i.bf16 %v1176_v16, %v1160_v38 }
 0x182   : > { %v1684_v50 = vpack.i.bf16 %v1174_v46, %v1158_v0  ;;  %v1047_v21 = vadd.f32 %v2312_v27, %v1046_v6  ;;  %v1111_v54 = vadd.f32 %v2312_v27, %v1110_v17  ;;  %v1161_v7 = vmax.f32 %v1055_v4, 0.0 }
 0x183   : > { %v1177_v10 = vmax.f32 %v1119_v15, 0.0 }
 0x184   : > { %v1159_v25 = vmax.f32 %v1047_v21, 0.0  ;;  %v1175_v39 = vmax.f32 %v1111_v54, 0.0  ;;  %1685 = vxpose.xlu0.b32.cont [5/16] (narrow) %v1684_v50, 16 }
 0x185   : > { %v1690_v48 = vpack.i.bf16 %v1177_v10, %v1161_v7 }
 0x186   : > { %v1686_v51 = vpack.i.bf16 %v1175_v39, %v1159_v25 }
 0x188   : > { %1687 = vxpose.xlu0.b32.cont [6/16] (narrow) %v1686_v51, 16 }
 0x18c   : > { %1689 = vxpose.xlu0.b32.cont [7/16] (narrow) %v1688_v13, 16 }
 0x190   : > { %1691 = vxpose.xlu0.b32.cont [8/16] (narrow) %v1690_v48, 16 }
 0x193   : > { %v1394_v42 = vpop.f32.mrf.mxu0  ;;  %v1410_v40 = vpop.f32.mrf.mxu1 }
 0x194   : > { %v1068_v35 = vadd.f32 %v1394_v42, %v2312_v27  ;;  %v1132_v5 = vadd.f32 %v1410_v40, %v2312_v27 }
 0x195   : > { %v1059_v52 = vpop.f32.mrf.mxu0  ;;  %v1123_v2 = vpop.f32.mrf.mxu1 }
 0x196   : > { %v1060_v9 = vadd.f32 %v2312_v27, %v1059_v52  ;;  %v1124_v31 = vadd.f32 %v2312_v27, %v1123_v2  ;;  %v1164_v62 = vmax.f32 %v1068_v35, 0.0  ;;  %v1180_v58 = vmax.f32 %v1132_v5, 0.0 }
 0x197   : > { %v1395_v19 = vpop.f32.mrf.mxu0  ;;  %v1411_v3 = vpop.f32.mrf.mxu1 }
 0x198   : > { %v1162_v12 = vmax.f32 %v1060_v9, 0.0  ;;  %v1178_v11 = vmax.f32 %v1124_v31, 0.0  ;;  %v1071_v24 = vadd.f32 %v1395_v19, %v2312_v27  ;;  %v1135_v63 = vadd.f32 %v1411_v3, %v2312_v27 }
 0x199   : > { %v1062_v14 = vpop.f32.mrf.mxu0  ;;  %v1126_v23 = vpop.f32.mrf.mxu1  ;;  %v1696_v59 = vpack.i.bf16 %v1180_v58, %v1164_v62 }
 0x19a   : > { %v1692_v44 = vpack.i.bf16 %v1178_v11, %v1162_v12  ;;  %v1063_v45 = vadd.f32 %v2312_v27, %v1062_v14  ;;  %v1127_v18 = vadd.f32 %v2312_v27, %v1126_v23  ;;  %v1165_v36 = vmax.f32 %v1071_v24, 0.0 }
 0x19b   : > { %v1181_v29 = vmax.f32 %v1135_v63, 0.0 }
 0x19c   : > { %v1163_v33 = vmax.f32 %v1063_v45, 0.0  ;;  %v1179_v37 = vmax.f32 %v1127_v18, 0.0  ;;  %1693 = vxpose.xlu0.b32.cont [9/16] (narrow) %v1692_v44, 16 }
 0x19d   : > { %v1698_v47 = vpack.i.bf16 %v1181_v29, %v1165_v36 }
 0x19e   : > { %v1694_v32 = vpack.i.bf16 %v1179_v37, %v1163_v33 }
 0x1a0   : > { %1695 = vxpose.xlu0.b32.cont [10/16] (narrow) %v1694_v32, 16 }
 0x1a4   : > { %1697 = vxpose.xlu0.b32.cont [11/16] (narrow) %v1696_v59, 16 }
 0x1a8   : > { %1699 = vxpose.xlu0.b32.cont [12/16] (narrow) %v1698_v47, 16 }
 0x1ab   : > { %v1398_v30 = vpop.f32.mrf.mxu0  ;;  %v1414_v20 = vpop.f32.mrf.mxu1 }
 0x1ac   : > { %v1084_v61 = vadd.f32 %v1398_v30, %v2312_v27  ;;  %v1148_v1 = vadd.f32 %v1414_v20, %v2312_v27 }
 0x1ad   : > { %v1075_v28 = vpop.f32.mrf.mxu0  ;;  %v1139_v41 = vpop.f32.mrf.mxu1 }
 0x1ae   : > { %v1076_v34 = vadd.f32 %v2312_v27, %v1075_v28  ;;  %v1140_v60 = vadd.f32 %v2312_v27, %v1139_v41  ;;  %v1168_v17 = vmax.f32 %v1084_v61, 0.0  ;;  %v1184_v56 = vmax.f32 %v1148_v1, 0.0 }
 0x1af   : > { %v1399_v57 = vpop.f32.mrf.mxu0  ;;  %v1415_v43 = vpop.f32.mrf.mxu1 }
 0x1b0   : > { %v1166_v22 = vmax.f32 %v1076_v34, 0.0  ;;  %v1182_v26 = vmax.f32 %v1140_v60, 0.0  ;;  %v1087_v50 = vadd.f32 %v1399_v57, %v2312_v27  ;;  %v1151_v21 = vadd.f32 %v1415_v43, %v2312_v27 }
 0x1b1   : > { %v1078_v55 = vpop.f32.mrf.mxu0  ;;  %v1142_v8 = vpop.f32.mrf.mxu1  ;;  %v1704_v25 = vpack.i.bf16 %v1184_v56, %v1168_v17 }
 0x1b2   : > { %v1700_v53 = vpack.i.bf16 %v1182_v26, %v1166_v22  ;;  %v1079_v0 = vadd.f32 %v2312_v27, %v1078_v55  ;;  %v1143_v46 = vadd.f32 %v2312_v27, %v1142_v8  ;;  %v1169_v39 = vmax.f32 %v1087_v50, 0.0 }
 0x1b3   : > { %v1185_v38 = vmax.f32 %v1151_v21, 0.0 }
 0x1b4   : > { %v1167_v49 = vmax.f32 %v1079_v0, 0.0  ;;  %v1183_v6 = vmax.f32 %v1143_v46, 0.0  ;;  %1701 = vxpose.xlu0.b32.cont [13/16] (narrow) %v1700_v53, 16 }
 0x1b5   : > { %v1706_v16 = vpack.i.bf16 %v1185_v38, %v1169_v39 }
 0x1b6   : > { %v1702_v54 = vpack.i.bf16 %v1183_v6, %v1167_v49 }
 0x1b8   : > { %1703 = vxpose.xlu0.b32.cont [14/16] (narrow) %v1702_v54, 16 }
 0x1bc   : > { %1705 = vxpose.xlu0.b32.cont [15/16] (narrow) %v1704_v25, 16 }
 0x1c0   : > { %1707 = vxpose.xlu0.b32.end [16/16] (narrow) %v1706_v16, 16 }
 0x200   : > { %v1708_v4 = vpop.trf.xlu0 }
 0x201   : > { %v1712_v15 = vunpack.i.h.bf16 %v1708_v4  ;;  %v1709_v51 = vunpack.i.l.bf16 %v1708_v4 }
 0x203   : > { %v1354_v13 = vpack.c.bf16 %v1712_v15, %v1709_v51 }
 0x204   : > { %v1713_v27 = vpop.trf.xlu0 }
 0x205   : > { %v1717_v7 = vunpack.i.h.bf16 %v1713_v27  ;;  %v1714_v10 = vunpack.i.l.bf16 %v1713_v27  ;;  %1262 = vst [vmem:[%s175_s8] sm:$0xff] %v1354_v13 }
 0x207   : > { %v1355_v48 = vpack.c.bf16 %v1717_v7, %v1714_v10 }
 0x209   : > { %1263 = vst [vmem:[%s175_s8 + $0x8] sm:$0xff] %v1355_v48 }
 0x20a PF: > { %s13_s12 = sadd.s32 1, %s1728_s12  }
 0x20b   : > { %p10_p5 = scmp.ge.s32.totalorder %s13_s12, 4  }
 0x20d   :  { %12 = sbr.rel (!%p10_p5) target bundleno = 1 (0x1), region = 62 }

// kernel: convnet_encoder2.4
= control target key start
LH: loop header
LB: loop body
LE: loop exit
PB: predicated region body
PF: predicated region fallthrough
CT: control target
= control target key end

     0   :  { %s931_s12 = smov 0   ;;  %s1196_s0 = inlined_call_operand.vmem [shape: bf16[8,5,5,64], index: 0, kind: input, shape index: {}]   ;;  %s1197_s1 = inlined_call_operand.vmem [shape: bf16[256,16], index: 1, kind: input, shape index: {}]   ;;  %s1198_s2 = inlined_call_operand.vmem [shape: f32[1,16], index: 2, kind: input, shape index: {}]   ;;  %s1199_s3 = inlined_call_operand.vmem [shape: bf16[2,16,64], index: 3, kind: output, shape index: {}]  }
   0x1 LB: > { %s937_s13 = sadd.s32 4294967295, %s908_s12   ;;  %p724_p0 = scmp.ge.s32.totalorder %s908_s12, 1  ;;  %s908_s12 = sphi %s931_s12, %s13_s12  }
   0x2   : > { %p139_p1 = scmp.lt.s32.totalorder %s908_s12, 3 }
   0x4   : > { %p140_p2 = pnand %p724_p0, %p139_p1 }
   0x5   : > { %s725_s14 = sshll.u32 (!%p140_p2), %s937_s13, 2  ;;  %s910_s10 = smov (!%p140_p2), 64  }
   0x6   : > { %143 = sbr.rel (%p140_p2) target bundleno = 483 (0x1e3), region = 32  ;;  %p165_p3 = scmp.lt.s32.totalorder (!%p140_p2), %s725_s14, 7 }
   0x7   : > { %p171_p4 = scmp.lt.s32.totalorder (!%p140_p2), %s937_s13, 1 }
   0xb   : > { %v886_v0 = vld [vmem:[%s1197_s1 + $0x78] sm:$0xff]   ;;  %s1201_s14 = smov (!%p165_p3, %s725_s14), 7  ;;  %v888_v2 = vld [vmem:[%s1197_s1 + $0x70] sm:$0xff]   ;;  %v890_v4 = vld [vmem:[%s1197_s1 + $0x68] sm:$0xff]   ;;  %vm317_vm0 = vcmask 523264   ;;  %s1203_s13 = smov (!%p171_p4, %s937_s13), 1 }
   0xc   : > { %v887_v1 = vld [vmem:[%s1197_s1 + $0x38] sm:$0xff]   ;;  %769 = vmatprep.subr.bf16.mxu0 %v886_v0  ;;  %809 = vmatprep.subr.bf16.mxu1 %v886_v0  ;;  %v889_v3 = vld [vmem:[%s1197_s1 + $0x30] sm:$0xff]   ;;  %s825_s23 = smul.u32 20, %s1201_s14  ;;  %v891_v5 = vld [vmem:[%s1197_s1 + $0x28] sm:$0xff]   ;;  %s766_s29 = sshll.u32 %s1203_s13, 3  ;;  %vm662_vm1 = vcmask 519168  }
   0xd   : > { %770 = vmatpush3.bf16.msra.mxu0 %v887_v1  ;;  %817 = vmatpush3.bf16.msra.mxu1 %v887_v1  ;;  %v892_v6 = vld [vmem:[%s1197_s1 + $0x60] sm:$0xff]   ;;  %v894_v39 = vld [vmem:[%s1197_s1 + $0x58] sm:$0xff]   ;;  %v896_v62 = vld [vmem:[%s1197_s1 + $0x50] sm:$0xff]   ;;  %s175_s5 = scalar_lea.vmem %s1199_s3, %s766_s29 }
   0xe   : > { %771 = vmatprep.subr.bf16.mxu0 %v888_v2  ;;  %810 = vmatprep.subr.bf16.mxu1 %v888_v2  ;;  %s963_s30 = scalar_lea.vmem %s1196_s0, %s825_s23  ;;  %v893_v32 = vld [vmem:[%s1197_s1 + $0x20] sm:$0xff]   ;;  %v895_v58 = vld [vmem:[%s1197_s1 + $0x18] sm:$0xff]   ;;  %v897_v1 = vld [vmem:[%s1197_s1 + $0x10] sm:$0xff]  }
   0xf   : > { %v969_v7 = vld [vmem:[%s963_s30 + $0x4] sm:$0x7]  ;;  %v972_v8 = vld [vmem:[%s963_s30 + $0x8] sm:$0x7]  ;;  %v975_v9 = vld [vmem:[%s963_s30] sm:$0x7] }
  0x10   : > { %v198_v10 = vunpack.c.l.bf16 %v969_v7  ;;  %v199_v11 = vunpack.c.l.bf16 %v972_v8  ;;  %v980_v12 = vld [vmem:[%s963_s30 + $0x18] sm:$0x7]  ;;  %v197_v13 = vunpack.c.l.bf16 %v975_v9  ;;  %v984_v14 = vld [vmem:[%s963_s30 + $0xc] sm:$0x7]  ;;  %v987_v15 = vld [vmem:[%s963_s30 + $0x10] sm:$0x7] }
  0x11   : > { %772 = vmatpush3.bf16.msra.mxu0 %v889_v3  ;;  %818 = vmatpush3.bf16.msra.mxu1 %v889_v3  ;;  %v203_v16 = vunpack.c.l.bf16 %v980_v12  ;;  %v200_v17 = vunpack.c.l.bf16 %v984_v14  ;;  %v201_v18 = vunpack.c.l.bf16 %v987_v15  ;;  %v993_v19 = vld [vmem:[%s963_s30 + $0x1c] sm:$0x7]  ;;  %v996_v20 = vld [vmem:[%s963_s30 + $0x20] sm:$0x7]  ;;  %v999_v21 = vld [vmem:[%s963_s30 + $0x2c] sm:$0x7] }
  0x12   : > { %773 = vmatprep.subr.bf16.mxu0 %v890_v4  ;;  %811 = vmatprep.subr.bf16.mxu1 %v890_v4  ;;  %v234_v22 = vrot.slane %v198_v10, 1  ;;  %v235_v23 = vrot.slane %v199_v11, 1  ;;  %v233_v24 = vrot.slane %v197_v13, 1  ;;  %v204_v25 = vunpack.c.l.bf16 %v993_v19  ;;  %v1009_v26 = vld [vmem:[%s963_s30 + $0x30] sm:$0x7] }
  0x13   : > { %v238_v27 = vrot.slane %v203_v16, 1  ;;  %v236_v28 = vrot.slane %v200_v17, 1  ;;  %v301_v29 = vrot.slane %v201_v18, 1  ;;  %v205_v30 = vunpack.c.l.bf16 %v996_v20  ;;  %v1019_v31 = vld [vmem:[%s963_s30 + $0x24] sm:$0x7] }
  0x14   : > { %v836_v33 = vpack.i.bf16 %v235_v23, %v234_v22  ;;  %v239_v34 = vrot.slane %v204_v25, 1  ;;  %v208_v35 = vunpack.c.l.bf16 %v999_v21  ;;  %v209_v36 = vunpack.c.l.bf16 %v1009_v26  ;;  %v1029_v37 = vld [vmem:[%s963_s30 + $0x34] sm:$0x7]  ;;  %v1041_v44 = vld [vmem:[%s963_s30 + $0x38] sm:$0x7] }
  0x15   : > { %774 = vmatpush3.bf16.msra.mxu0 %v891_v5  ;;  %819 = vmatpush3.bf16.msra.mxu1 %v891_v5  ;;  %v1032_v38 = vld [vmem:[%s963_s30 + $0x14] sm:$0x7]  ;;  %v846_v40 = vpack.i.bf16 %v238_v27, %v233_v24  ;;  %v841_v41 = vpack.i.bf16 %v301_v29, %v236_v28  ;;  %v240_v42 = vrot.slane %v205_v30, 1  ;;  %v206_v43 = vunpack.c.l.bf16 %v1019_v31  ;;  %v1044_v45 = vld [vmem:[%s963_s30 + $0x28] sm:$0x7] }
  0x16   : > { %775 = vmatprep.subr.bf16.mxu0 %v892_v6  ;;  %812 = vmatprep.subr.bf16.mxu1 %v892_v6  ;;  %v242_v46 = vrot.slane %v208_v35, 1  ;;  %v243_v47 = vrot.slane %v209_v36, 1  ;;  %v210_v48 = vunpack.c.l.bf16 %v1029_v37  ;;  %v202_v49 = vunpack.c.l.bf16 %v1032_v38  ;;  %v1054_v50 = vld [vmem:[%s963_s30 + $0x40] sm:$0x7]  ;;  %v1057_v51 = vld [vmem:[%s963_s30 + $0x44] sm:$0x7] }
  0x17   : > { %837 = vrot.lane.b32.xlu0 %v836_v33, %s910_s10  ;;  %847 = vrot.lane.b32.xlu1 %v846_v40, %s910_s10  ;;  %v851_v52 = vpack.i.bf16 %v240_v42, %v239_v34  ;;  %v302_v53 = vrot.slane %v206_v43, 1  ;;  %v211_v54 = vunpack.c.l.bf16 %v1041_v44  ;;  %v207_v55 = vunpack.c.l.bf16 %v1044_v45  ;;  %v1065_v56 = vld [vmem:[%s963_s30 + $0x48] sm:$0x7]  ;;  %v1068_v57 = vld [vmem:[%s963_s30 + $0x3c] sm:$0x7] }
  0x18   : > { %v244_v59 = vrot.slane %v210_v48, 1  ;;  %v213_v60 = vunpack.c.l.bf16 %v1054_v50  ;;  %v1077_v61 = vld [vmem:[%s963_s30 + $0x4c] sm:$0x7]  ;;  %v856_v63 = vpack.i.bf16 %v243_v47, %v242_v46  ;;  %v214_v0 = vunpack.c.l.bf16 %v1057_v51  ;;  %v901_v47 = vld [vmem:[%s1197_s1] sm:$0xff]  }
  0x19   : > { %776 = vmatpush3.bf16.msra.mxu0 %v893_v32  ;;  %820 = vmatpush3.bf16.msra.mxu1 %v893_v32  ;;  %v237_v2 = vrot.slane %v202_v49, 1  ;;  %v303_v3 = vrot.slane %v211_v54, 1  ;;  %v215_v4 = vunpack.c.l.bf16 %v1065_v56  ;;  %v212_v5 = vunpack.c.l.bf16 %v1068_v57  ;;  %v898_v28 = vld [vmem:[%s1197_s1 + $0x48] sm:$0xff]   ;;  %v745_v57 = vld [vmem:[%s1198_s2] ss:$0 sm:$0xff] }
  0x1a   : > { %777 = vmatprep.subr.bf16.mxu0 %v894_v39  ;;  %813 = vmatprep.subr.bf16.mxu1 %v894_v39  ;;  %v861_v6 = vpack.i.bf16 %v302_v53, %v244_v59  ;;  %v241_v22 = vrot.slane %v207_v55, 1  ;;  %v246_v23 = vrot.slane %v213_v60, 1  ;;  %v216_v24 = vunpack.c.l.bf16 %v1077_v61  ;;  %v899_v40 = vld [vmem:[%s1197_s1 + $0x8] sm:$0xff]  }
  0x1b   : > { %842 = vrot.lane.b32.xlu0 %v841_v41, %s910_s10  ;;  %852 = vrot.lane.b32.xlu1 %v851_v52, %s910_s10  ;;  %v247_v27 = vrot.slane %v214_v0, 1  ;;  %v866_v29 = vpack.i.bf16 %v237_v2, %v303_v3  ;;  %v248_v32 = vrot.slane %v215_v4, 1  ;;  %v245_v33 = vrot.slane %v212_v5, 1  ;;  %v900_v41 = vld [vmem:[%s1197_s1 + $0x40] sm:$0xff]  }
  0x1c   : > { %v871_v34 = vpack.i.bf16 %v246_v23, %v241_v22  ;;  %v304_v39 = vrot.slane %v216_v24, 1 }
  0x1d   : > { %778 = vmatpush3.bf16.msra.mxu0 %v895_v58  ;;  %821 = vmatpush3.bf16.msra.mxu1 %v895_v58  ;;  %v876_v42 = vpack.i.bf16 %v248_v32, %v247_v27 }
  0x1e   : > { %779 = vmatprep.subr.bf16.mxu0 %v896_v62  ;;  %814 = vmatprep.subr.bf16.mxu1 %v896_v62  ;;  %v881_v46 = vpack.i.bf16 %v245_v33, %v304_v39 }
  0x1f   : > { %857 = vrot.lane.b32.xlu0 %v856_v63, %s910_s10  ;;  %862 = vrot.lane.b32.xlu1 %v861_v6, %s910_s10 }
  0x21   : > { %780 = vmatpush3.bf16.msra.mxu0 %v897_v1  ;;  %822 = vmatpush3.bf16.msra.mxu1 %v897_v1 }
  0x22   : > { %781 = vmatprep.subr.bf16.mxu0 %v898_v28  ;;  %815 = vmatprep.subr.bf16.mxu1 %v898_v28 }
  0x23   : > { %867 = vrot.lane.b32.xlu0 %v866_v29, %s910_s10  ;;  %872 = vrot.lane.b32.xlu1 %v871_v34, %s910_s10 }
  0x25   : > { %782 = vmatpush3.bf16.msra.mxu0 %v899_v40  ;;  %823 = vmatpush3.bf16.msra.mxu1 %v899_v40 }
  0x26   : > { %783 = vmatprep.subr.bf16.mxu0 %v900_v41  ;;  %816 = vmatprep.subr.bf16.mxu1 %v900_v41 }
  0x27   : > { %877 = vrot.lane.b32.xlu0 %v876_v42, %s910_s10  ;;  %882 = vrot.lane.b32.xlu1 %v881_v46, %s910_s10 }
  0x29   : > { %784 = vmatpush3.bf16.msra.mxu0 %v901_v47  ;;  %824 = vmatpush3.bf16.msra.mxu1 %v901_v47 }
  0x89   : > { %v838_v52 = vpop.permute.xlu0 %837  ;;  %v848_v59 = vpop.permute.xlu1 %847 }
  0x8a   : > { %v840_v53 = vunpack.i.h.bf16 %v838_v52  ;;  %v839_v58 = vunpack.i.l.bf16 %v838_v52  ;;  %v849_v62 = vunpack.i.l.bf16 %v848_v59  ;;  %v850_v63 = vunpack.i.h.bf16 %v848_v59 }
  0x8c   : > { %v319_v2 = vsel %vm317_vm0, %v198_v10, %v839_v58  ;;  %v318_v23 = vsel %vm317_vm0, %v197_v13, %v849_v62  ;;  %v320_v27 = vsel %vm317_vm0, %v199_v11, %v840_v53  ;;  %v323_v32 = vsel %vm317_vm0, %v203_v16, %v850_v63 }
  0x8d   : > { %v843_v1 = vpop.permute.xlu0 %842  ;;  %v853_v22 = vpop.permute.xlu1 %852  ;;  %v729_v13 = vcombine.low %v318_v23, %v319_v2  ;;  %v730_v33 = vcombine.low %v319_v2, %v320_v27 }
  0x8e   : > { %v845_v3 = vunpack.i.h.bf16 %v843_v1  ;;  %v844_v6 = vunpack.i.l.bf16 %v843_v1  ;;  %v855_v28 = vunpack.i.h.bf16 %v853_v22  ;;  %v854_v29 = vunpack.i.l.bf16 %v853_v22 }
  0x90   : > { %v321_v7 = vsel %vm317_vm0, %v200_v17, %v844_v6  ;;  %v334_v9 = vsel %vm317_vm0, %v201_v18, %v845_v3  ;;  %v325_v11 = vsel %vm317_vm0, %v205_v30, %v855_v28  ;;  %v324_v12 = vsel %vm317_vm0, %v204_v25, %v854_v29 }
  0x91   : > { %v858_v10 = vpop.permute.xlu0 %857  ;;  %v731_v8 = vcombine.low %v320_v27, %v321_v7  ;;  %v732_v34 = vcombine.low %v321_v7, %v334_v9  ;;  %v863_v17 = vpop.permute.xlu1 %862  ;;  %v734_v20 = vcombine.low %v323_v32, %v324_v12  ;;  %v735_v58 = vcombine.low %v324_v12, %v325_v11 }
  0x92   : > { %v860_v14 = vunpack.i.h.bf16 %v858_v10  ;;  %v859_v16 = vunpack.i.l.bf16 %v858_v10  ;;  %v865_v39 = vunpack.i.h.bf16 %v863_v17  ;;  %v864_v15 = vunpack.i.l.bf16 %v863_v17 }
  0x93   : > { %v407_v40 = vpack.c.bf16 %v732_v34, %v730_v33  ;;  %v406_v18 = vpack.c.bf16 %v731_v8, %v729_v13 }
  0x94   : > { %v335_v41 = vsel %vm317_vm0, %v206_v43, %v865_v39  ;;  %v327_v19 = vsel %vm317_vm0, %v208_v35, %v859_v16  ;;  %v328_v25 = vsel %vm317_vm0, %v209_v36, %v860_v14  ;;  %v329_v31 = vsel %vm317_vm0, %v210_v48, %v864_v15 }
  0x95   : > { %v868_v42 = vpop.permute.xlu0 %867  ;;  %581 = vmatprep.mubr.bf16.mxu0 %v407_v40  ;;  %v873_v47 = vpop.permute.xlu1 %872  ;;  %v736_v52 = vcombine.low %v325_v11, %v335_v41  ;;  %v738_v36 = vcombine.low %v327_v19, %v328_v25  ;;  %v739_v62 = vcombine.low %v328_v25, %v329_v31 }
  0x96   : > { %v870_v30 = vunpack.i.h.bf16 %v868_v42  ;;  %v869_v46 = vunpack.i.l.bf16 %v868_v42  ;;  %582 = vmatmul.mubr.bf16.vlgmr.msra.gmra.mxu0 %v406_v18  ;;  %v875_v43 = vunpack.i.h.bf16 %v873_v47  ;;  %v874_v53 = vunpack.i.l.bf16 %v873_v47 }
  0x97   : > { %v409_v35 = vpack.c.bf16 %v736_v52, %v734_v20 }
  0x98   : > { %v322_v21 = vsel %vm317_vm0, %v202_v49, %v870_v30  ;;  %v336_v26 = vsel %vm317_vm0, %v211_v54, %v869_v46  ;;  %v326_v37 = vsel %vm317_vm0, %v207_v55, %v874_v53  ;;  %v331_v38 = vsel %vm317_vm0, %v213_v60, %v875_v43 }
  0x99   : > { %v878_v59 = vpop.permute.xlu0 %877  ;;  %v740_v48 = vcombine.low %v329_v31, %v336_v26  ;;  %v733_v63 = vcombine.low %v322_v21, %v323_v32  ;;  %589 = vmatprep.mubr.bf16.mxu0 %v409_v35  ;;  %v883_v2 = vpop.permute.xlu1 %882  ;;  %v737_v44 = vcombine.low %v326_v37, %v327_v19 }
  0x9a   : > { %v880_v49 = vunpack.i.h.bf16 %v878_v59  ;;  %v879_v1 = vunpack.i.l.bf16 %v878_v59  ;;  %v885_v3 = vunpack.i.h.bf16 %v883_v2  ;;  %v884_v54 = vunpack.i.l.bf16 %v883_v2 }
  0x9b   : > { %v411_v6 = vpack.c.bf16 %v740_v48, %v738_v36  ;;  %v408_v22 = vpack.c.bf16 %v735_v58, %v733_v63  ;;  %v410_v50 = vpack.c.bf16 %v739_v62, %v737_v44 }
  0x9c   : > { %v333_v45 = vsel %vm317_vm0, %v215_v4, %v880_v49  ;;  %v332_v55 = vsel %vm317_vm0, %v214_v0, %v879_v1  ;;  %v330_v60 = vsel %vm317_vm0, %v212_v5, %v885_v3  ;;  %v337_v23 = vsel %vm317_vm0, %v216_v24, %v884_v54 }
  0x9d   : > { %597 = vmatprep.mubr.bf16.mxu1 %v411_v6  ;;  %v742_v27 = vcombine.low %v331_v38, %v332_v55  ;;  %v744_v56 = vcombine.low %v333_v45, %v337_v23  ;;  %v741_v28 = vcombine.low %v330_v60, %v331_v38  ;;  %v743_v4 = vcombine.low %v332_v55, %v333_v45 }
  0x9e   : > { %590 = vmatmul.mubr.bf16.gmra.mxu0 %v408_v22  ;;  %598 = vmatmul.mubr.bf16.vlgmr.msra.gmra.mxu1 %v410_v50 }
  0x9f   : > { %v413_v29 = vpack.c.bf16 %v744_v56, %v742_v27  ;;  %v412_v51 = vpack.c.bf16 %v743_v4, %v741_v28 }
  0xa1   : > { %605 = vmatprep.mubr.bf16.mxu1 %v413_v29 }
  0xa6   : > { %606 = vmatmul.mubr.bf16.gmra.mxu1 %v412_v51 }
 0x156   : > { %v785_v0 = vpop.f32.mrf.mxu0 }
 0x158   : > { %v786_v32 = vpop.f32.mrf.mxu0 }
 0x159   : > { %v787_v61 = vadd.f32 %v786_v32, %v785_v0 }
 0x15a   : > { %v788_v5 = vpop.f32.mrf.mxu0 }
 0x15b   : > { %v584_v24 = vadd.f32 %v787_v61, %v745_v57 }
 0x15c   : > { %v789_v7 = vpop.f32.mrf.mxu0 }
 0x15d   : > { %v790_v9 = vadd.f32 %v789_v7, %v788_v5  ;;  %v614_v10 = vmax.f32 %v584_v24, 0.0 }
 0x15e   : > { %v791_v13 = vpop.f32.mrf.mxu0  ;;  %v797_v33 = vpop.f32.mrf.mxu1 }
 0x15f   : > { %v587_v8 = vadd.f32 %v790_v9, %v745_v57  ;;  %622 = vxpose.xlu0.b32.start [1/8] (short) (narrow) %v614_v10, 16 }
 0x160   : > { %v792_v34 = vpop.f32.mrf.mxu0  ;;  %v798_v11 = vpop.f32.mrf.mxu1 }
 0x161   : > { %v615_v12 = vmax.f32 %v587_v8, 0.0  ;;  %v793_v14 = vadd.f32 %v792_v34, %v791_v13  ;;  %v799_v41 = vadd.f32 %v798_v11, %v797_v33 }
 0x162   : > { %v794_v16 = vpop.f32.mrf.mxu0  ;;  %v800_v17 = vpop.f32.mrf.mxu1 }
 0x163   : > { %v592_v39 = vadd.f32 %v793_v14, %v745_v57  ;;  %623 = vxpose.xlu0.b32.cont [2/8] (short) (narrow) %v615_v12, 16  ;;  %v600_v30 = vadd.f32 %v799_v41, %v745_v57 }
 0x164   : > { %v795_v15 = vpop.f32.mrf.mxu0  ;;  %v801_v40 = vpop.f32.mrf.mxu1 }
 0x165   : > { %v616_v18 = vmax.f32 %v592_v39, 0.0  ;;  %v796_v42 = vadd.f32 %v795_v15, %v794_v16  ;;  %v802_v47 = vadd.f32 %v801_v40, %v800_v17  ;;  %v618_v31 = vmax.f32 %v600_v30, 0.0 }
 0x166   : > { %v803_v20 = vpop.f32.mrf.mxu1 }
 0x167   : > { %v595_v19 = vadd.f32 %v796_v42, %v745_v57  ;;  %624 = vxpose.xlu0.b32.cont [3/8] (short) (narrow) %v616_v18, 16  ;;  %v603_v43 = vadd.f32 %v802_v47, %v745_v57 }
 0x168   : > { %v804_v25 = vpop.f32.mrf.mxu1 }
 0x169   : > { %v617_v46 = vmax.f32 %v595_v19, 0.0  ;;  %v805_v53 = vadd.f32 %v804_v25, %v803_v20  ;;  %v619_v21 = vmax.f32 %v603_v43, 0.0 }
 0x16a   : > { %v806_v52 = vpop.f32.mrf.mxu1 }
 0x16b   : > { %625 = vxpose.xlu0.b32.cont [4/8] (short) (narrow) %v617_v46, 16  ;;  %v608_v35 = vadd.f32 %v805_v53, %v745_v57 }
 0x16c   : > { %v807_v58 = vpop.f32.mrf.mxu1 }
 0x16d   : > { %v808_v26 = vadd.f32 %v807_v58, %v806_v52  ;;  %v620_v36 = vmax.f32 %v608_v35, 0.0 }
 0x16f   : > { %626 = vxpose.xlu0.b32.cont [5/8] (short) (narrow) %v618_v31, 16  ;;  %v611_v59 = vadd.f32 %v808_v26, %v745_v57 }
 0x171   : > { %v621_v37 = vmax.f32 %v611_v59, 0.0 }
 0x173   : > { %627 = vxpose.xlu0.b32.cont [6/8] (short) (narrow) %v619_v21, 16 }
 0x177   : > { %628 = vxpose.xlu0.b32.cont [7/8] (short) (narrow) %v620_v36, 16 }
 0x17b   : > { %629 = vxpose.xlu0.b32.end [8/8] (short) (narrow) %v621_v37, 16 }
 0x1db   : > { %v638_v62 = vpop.trf.xlu0 }
 0x1dc   : > { %v767_v48 = vpack.c.bf16 %v638_v62, %v638_v62 }
 0x1de   : > { %663 = vst.msk [vmem:[%s175_s5] sm:$0xf] %vm662_vm1, %v767_v48 }
 0x1df   : > { %v639_v63 = vpop.trf.xlu0 }
 0x1e0   : > { %v768_v38 = vpack.c.bf16 %v639_v63, %v639_v63 }
 0x1e2   : > { %664 = vst.msk [vmem:[%s175_s5 + $0x4] sm:$0xf] %vm662_vm1, %v768_v38 }
 0x1e3 PF: > { %s13_s12 = sadd.s32 1, %s908_s12  }
 0x1e4   : > { %p10_p5 = scmp.ge.s32.totalorder %s13_s12, 4  }
 0x1e6   :  { %12 = sbr.rel (!%p10_p5) target bundleno = 1 (0x1), region = 62 }

// kernel: convnet_encoder2.5
= control target key start
LH: loop header
LB: loop body
LE: loop exit
PB: predicated region body
PF: predicated region fallthrough
CT: control target
= control target key end

     0   :  { %s1775_s18 = smov 0   ;;  %s2395_s0 = inlined_call_operand.vmem [shape: bf16[8,3,3,64], index: 0, kind: input, shape index: {}]   ;;  %s2396_s1 = inlined_call_operand.vmem [shape: bf16[256,32], index: 1, kind: input, shape index: {}]   ;;  %s2397_s2 = inlined_call_operand.vmem [shape: f32[1,32], index: 2, kind: input, shape index: {}]   ;;  %s2398_s3 = inlined_call_operand.vmem [shape: bf16[288,32], index: 3, kind: input, shape index: {}]   ;;  %s2399_s4 = inlined_call_operand.vmem [shape: f32[1,32], index: 4, kind: input, shape index: {}]   ;;  %s2400_s5 = inlined_call_operand.vmem [shape: f32[2,32,16], index: 5, kind: output, shape index: {}]  }
   0x1 LB: > { %s1781_s19 = sadd.s32 4294967295, %s1737_s18   ;;  %p1544_p0 = scmp.ge.s32.totalorder %s1737_s18, 1  ;;  %s1737_s18 = sphi %s1775_s18, %s15_s18  }
   0x2   : > { %p189_p1 = scmp.lt.s32.totalorder %s1737_s18, 3 }
   0x4   : > { %p190_p2 = pnand %p1544_p0, %p189_p1 }
   0x5   : > { %s1545_s20 = sshll.u32 (!%p190_p2), %s1781_s19, 2  ;;  %s1741_s10 = smov (!%p190_p2), 32  }
   0x6   : > { %193 = sbr.rel (%p190_p2) target bundleno = 909 (0x38d), region = 40  ;;  %p219_p3 = scmp.lt.s32.totalorder (!%p190_p2), %s1545_s20, 7 }
   0x7   : > { %p225_p4 = scmp.lt.s32.totalorder (!%p190_p2), %s1781_s19, 1 }
   0xb   : > { %v1697_v0 = vld [vmem:[%s2396_s1 + $0x78] sm:$0xff]   ;;  %s2402_s20 = smov (!%p219_p3, %s1545_s20), 7  ;;  %v1699_v2 = vld [vmem:[%s2396_s1 + $0x70] sm:$0xff]   ;;  %v1701_v4 = vld [vmem:[%s2396_s1 + $0x68] sm:$0xff]   ;;  %vm624_vm0 = vcmask 257024   ;;  %vm634_vm1 = vcmask 253952  }
   0xc   : > { %v1698_v1 = vld [vmem:[%s2396_s1 + $0x38] sm:$0xff]   ;;  %1597 = vmatprep.subr.bf16.mxu0 %v1697_v0  ;;  %v1700_v3 = vld [vmem:[%s2396_s1 + $0x30] sm:$0xff]   ;;  %s1652_s29 = smul.u32 6, %s2402_s20  ;;  %v1702_v5 = vld [vmem:[%s2396_s1 + $0x28] sm:$0xff]   ;;  %s1739_s20 = smov 64   ;;  %v1740_v58 = vmov 0.0  }
   0xd   : > { %1598 = vmatpush3.bf16.msra.mxu0 %v1698_v1  ;;  %v1703_v6 = vld [vmem:[%s2396_s1 + $0x60] sm:$0xff]   ;;  %v1705_v38 = vld [vmem:[%s2396_s1 + $0x58] sm:$0xff]   ;;  %v1707_v50 = vld [vmem:[%s2396_s1 + $0x50] sm:$0xff]   ;;  %625 = vst.msk [vmem:[#allocation2] sm:$0xf] %vm624_vm0, %v1740_v58  ;;  %vm315_vm2 = vcmask 523264  }
   0xe   : > { %1599 = vmatprep.subr.bf16.mxu0 %v1699_v2  ;;  %s1807_s11 = scalar_lea.vmem %s2395_s0, %s1652_s29  ;;  %v1704_v32 = vld [vmem:[%s2396_s1 + $0x20] sm:$0xff]   ;;  %v1706_v48 = vld [vmem:[%s2396_s1 + $0x18] sm:$0xff]   ;;  %v1708_v53 = vld [vmem:[%s2396_s1 + $0x10] sm:$0xff]   ;;  %626 = vst.msk [vmem:[#allocation2 + $0x10] sm:$0xf] %vm624_vm0, %v1740_v58  ;;  %vm1744_vm3 = vmmov 0  }
   0xf   : > { %v1813_v7 = vld [vmem:[%s1807_s11 + $0xc] sm:$0x3]  ;;  %v1816_v8 = vld [vmem:[%s1807_s11 + $0xe] sm:$0x3]  ;;  %v1819_v9 = vld [vmem:[%s1807_s11] sm:$0x3] }
  0x10   : > { %v249_v10 = vunpack.c.l.bf16 %v1813_v7  ;;  %v250_v11 = vunpack.c.l.bf16 %v1816_v8  ;;  %v1824_v12 = vld [vmem:[%s1807_s11 + $0x2] sm:$0x3]  ;;  %v243_v13 = vunpack.c.l.bf16 %v1819_v9  ;;  %v1828_v14 = vld [vmem:[%s1807_s11 + $0x12] sm:$0x3]  ;;  %v1831_v15 = vld [vmem:[%s1807_s11 + $0x14] sm:$0x3] }
  0x11   : > { %1600 = vmatpush3.bf16.msra.mxu0 %v1700_v3  ;;  %v244_v16 = vunpack.c.l.bf16 %v1824_v12  ;;  %v252_v17 = vunpack.c.l.bf16 %v1828_v14  ;;  %v253_v18 = vunpack.c.l.bf16 %v1831_v15  ;;  %v1837_v19 = vld [vmem:[%s1807_s11 + $0x6] sm:$0x3]  ;;  %v1840_v20 = vld [vmem:[%s1807_s11 + $0x8] sm:$0x3]  ;;  %v1843_v21 = vld [vmem:[%s1807_s11 + $0x10] sm:$0x3] }
  0x12   : > { %1601 = vmatprep.subr.bf16.mxu0 %v1701_v4  ;;  %v267_v22 = vrot.slane %v249_v10, 1  ;;  %v268_v23 = vrot.slane %v250_v11, 1  ;;  %v263_v24 = vrot.slane %v243_v13, 1  ;;  %v246_v25 = vunpack.c.l.bf16 %v1837_v19  ;;  %v1853_v26 = vld [vmem:[%s1807_s11 + $0x16] sm:$0x3]  ;;  %v1709_v54 = vld [vmem:[%s2396_s1 + $0x48] sm:$0xff]  }
  0x13   : > { %v264_v27 = vrot.slane %v244_v16, 1  ;;  %v269_v28 = vrot.slane %v252_v17, 1  ;;  %v270_v29 = vrot.slane %v253_v18, 1  ;;  %v247_v30 = vunpack.c.l.bf16 %v1840_v20  ;;  %v1863_v31 = vld [vmem:[%s1807_s11 + $0x4] sm:$0x3]  ;;  %v1710_v55 = vld [vmem:[%s2396_s1 + $0x8] sm:$0xff]  }
  0x14   : > { %v1677_v33 = vpack.i.bf16 %v268_v23, %v267_v22  ;;  %v265_v34 = vrot.slane %v246_v25, 1  ;;  %v251_v35 = vunpack.c.l.bf16 %v1843_v21  ;;  %v254_v36 = vunpack.c.l.bf16 %v1853_v26  ;;  %v1873_v37 = vld [vmem:[%s1807_s11 + $0xa] sm:$0x3]  ;;  %v1711_v56 = vld [vmem:[%s2396_s1 + $0x40] sm:$0xff]   ;;  %627 = vst.msk [vmem:[#allocation2 + $0x20] sm:$0xf] %vm624_vm0, %v1740_v58 }
  0x15   : > { %1602 = vmatpush3.bf16.msra.mxu0 %v1702_v5  ;;  %v1667_v39 = vpack.i.bf16 %v264_v27, %v263_v24  ;;  %v266_v40 = vrot.slane %v247_v30, 1  ;;  %v245_v41 = vunpack.c.l.bf16 %v1863_v31  ;;  %v1682_v42 = vpack.i.bf16 %v270_v29, %v269_v28  ;;  %v1712_v57 = vld [vmem:[%s2396_s1] sm:$0xff]   ;;  %628 = vst.msk [vmem:[#allocation2 + $0x30] sm:$0xf] %vm624_vm0, %v1740_v58  ;;  %630 = vst.msk [vmem:[#allocation2 + $0xc] sm:$0xf] %vm624_vm0, %v1740_v58 }
  0x16   : > { %1603 = vmatprep.subr.bf16.mxu0 %v1703_v6  ;;  %1678 = vrot.lane.b32.xlu1 %v1677_v33, %s1739_s20  ;;  %v301_v43 = vrot.slane %v251_v35, 1  ;;  %v302_v44 = vrot.slane %v254_v36, 1  ;;  %v248_v45 = vunpack.c.l.bf16 %v1873_v37  ;;  %631 = vst.msk [vmem:[#allocation2 + $0x1c] sm:$0xf] %vm624_vm0, %v1740_v58  ;;  %632 = vst.msk [vmem:[#allocation2 + $0x2c] sm:$0xf] %vm624_vm0, %v1740_v58  ;;  %v344_v28 = vlaneseq }
  0x17   : > { %1668 = vrot.lane.b32.xlu0 %v1667_v39, %s1739_s20  ;;  %v1672_v46 = vpack.i.bf16 %v266_v40, %v265_v34  ;;  %v299_v47 = vrot.slane %v245_v41, 1  ;;  %633 = vst.msk [vmem:[#allocation2 + $0x3c] sm:$0xf] %vm624_vm0, %v1740_v58  ;;  %v1742_v24 = vmov 1983009808   ;;  %s1743_s11 = smov 96  }
  0x18   : > { %v300_v49 = vrot.slane %v248_v45, 1  ;;  %v1692_v51 = vpack.i.bf16 %v302_v44, %v301_v43  ;;  %636 = vst.msk [vmem:[#allocation2 + $0x4] sm:$0x1] %vm634_vm1, %v1740_v58  ;;  %637 = vst.msk [vmem:[#allocation2 + $0x8] sm:$0x1] %vm634_vm1, %v1740_v58  ;;  %v342_v27 = vunpack.c.l.s4 %v1742_v24  ;;  %v345_v44 = vshrl.u32 %v344_v28, 7 }
  0x19   : > { %1604 = vmatpush3.bf16.msra.mxu0 %v1704_v32  ;;  %640 = vst.msk [vmem:[#allocation2 + $0x14] sm:$0x1] %vm634_vm1, %v1740_v58  ;;  %641 = vst.msk [vmem:[#allocation2 + $0x18] sm:$0x1] %vm634_vm1, %v1740_v58  ;;  %vm937_vm4 = vcmask 261120   ;;  %vm712_vm5 = vcmask 254976  }
  0x1a   : > { %1605 = vmatprep.subr.bf16.mxu0 %v1705_v38  ;;  %1683 = vrot.lane.b32.xlu1 %v1682_v42, %s1739_s20  ;;  %v1687_v52 = vpack.i.bf16 %v300_v49, %v299_v47  ;;  %644 = vst.msk [vmem:[#allocation2 + $0x24] sm:$0x1] %vm634_vm1, %v1740_v58  ;;  %645 = vst.msk [vmem:[#allocation2 + $0x28] sm:$0x1] %vm634_vm1, %v1740_v58  ;;  %v343_v43 = vunpack.c.0.s8 %v342_v27  ;;  %vm954_vm6 = vcmask 785408   ;;  %s2404_s19 = smov (!%p225_p4, %s1781_s19), 1 }
  0x1b   : > { %1673 = vrot.lane.b32.xlu0 %v1672_v46, %s1739_s20  ;;  %648 = vst.msk [vmem:[#allocation2 + $0x34] sm:$0x1] %vm634_vm1, %v1740_v58  ;;  %649 = vst.msk [vmem:[#allocation2 + $0x38] sm:$0x1] %vm634_vm1, %v1740_v58  ;;  %s1596_s7 = sshll.u32 %s2404_s19, 5  ;;  %vm1480_vm7 = vcmask 130048  }
  0x1c   : > { %652 = vst.msk [vmem:[#allocation2 + $0x7] sm:$0x1] %vm634_vm1, %v1740_v58  ;;  %653 = vst.msk [vmem:[#allocation2 + $0xb] sm:$0x1] %vm634_vm1, %v1740_v58  ;;  %s229_s12 = scalar_lea.vmem %s2400_s5, %s1596_s7 }
  0x1d   : > { %1606 = vmatpush3.bf16.msra.mxu0 %v1706_v48  ;;  %656 = vst.msk [vmem:[#allocation2 + $0x17] sm:$0x1] %vm634_vm1, %v1740_v58  ;;  %657 = vst.msk [vmem:[#allocation2 + $0x1b] sm:$0x1] %vm634_vm1, %v1740_v58 }
  0x1e   : > { %1607 = vmatprep.subr.bf16.mxu0 %v1707_v50  ;;  %1693 = vrot.lane.b32.xlu1 %v1692_v51, %s1739_s20  ;;  %660 = vst.msk [vmem:[#allocation2 + $0x27] sm:$0x1] %vm634_vm1, %v1740_v58  ;;  %661 = vst.msk [vmem:[#allocation2 + $0x2b] sm:$0x1] %vm634_vm1, %v1740_v58 }
  0x1f   : > { %1688 = vrot.lane.b32.xlu0 %v1687_v52, %s1739_s20  ;;  %664 = vst.msk [vmem:[#allocation2 + $0x37] sm:$0x1] %vm634_vm1, %v1740_v58  ;;  %665 = vst.msk [vmem:[#allocation2 + $0x3b] sm:$0x1] %vm634_vm1, %v1740_v58 }
  0x20   : > { %635 = vst.msk [vmem:[#allocation2] sm:$0x1] %vm634_vm1, %v1740_v58  ;;  %651 = vst.msk [vmem:[#allocation2 + $0x3] sm:$0x1] %vm634_vm1, %v1740_v58 }
  0x21   : > { %1608 = vmatpush3.bf16.msra.mxu0 %v1708_v53  ;;  %639 = vst.msk [vmem:[#allocation2 + $0x10] sm:$0x1] %vm634_vm1, %v1740_v58  ;;  %655 = vst.msk [vmem:[#allocation2 + $0x13] sm:$0x1] %vm634_vm1, %v1740_v58 }
  0x22   : > { %1609 = vmatprep.subr.bf16.mxu0 %v1709_v54  ;;  %638 = vst.msk [vmem:[#allocation2 + $0xc] sm:$0x1] %vm634_vm1, %v1740_v58  ;;  %642 = vst.msk [vmem:[#allocation2 + $0x1c] sm:$0x1] %vm634_vm1, %v1740_v58 }
  0x23   : > { %643 = vst.msk [vmem:[#allocation2 + $0x20] sm:$0x1] %vm634_vm1, %v1740_v58  ;;  %646 = vst.msk [vmem:[#allocation2 + $0x2c] sm:$0x1] %vm634_vm1, %v1740_v58 }
  0x24   : > { %647 = vst.msk [vmem:[#allocation2 + $0x30] sm:$0x1] %vm634_vm1, %v1740_v58  ;;  %650 = vst.msk [vmem:[#allocation2 + $0x3c] sm:$0x1] %vm634_vm1, %v1740_v58 }
  0x25   : > { %1610 = vmatpush3.bf16.msra.mxu0 %v1710_v55  ;;  %654 = vst.msk [vmem:[#allocation2 + $0xf] sm:$0x1] %vm634_vm1, %v1740_v58  ;;  %658 = vst.msk [vmem:[#allocation2 + $0x1f] sm:$0x1] %vm634_vm1, %v1740_v58 }
  0x26   : > { %1611 = vmatprep.subr.bf16.mxu0 %v1711_v56  ;;  %659 = vst.msk [vmem:[#allocation2 + $0x23] sm:$0x1] %vm634_vm1, %v1740_v58  ;;  %662 = vst.msk [vmem:[#allocation2 + $0x2f] sm:$0x1] %vm634_vm1, %v1740_v58 }
  0x27   : > { %663 = vst.msk [vmem:[#allocation2 + $0x33] sm:$0x1] %vm634_vm1, %v1740_v58  ;;  %666 = vst.msk [vmem:[#allocation2 + $0x3f] sm:$0x1] %vm634_vm1, %v1740_v58  ;;  %v1990_v59 = vld [vmem:[#allocation2] sm:$0xf] }
  0x28   : > { %v1992_v60 = vld [vmem:[#allocation2 + $0x10] sm:$0xf]  ;;  %v745_v61 = vrot.slane %v1990_v59, 1  ;;  %v777_v5 = vrot.slane %v1990_v59, 2 }
  0x29   : > { %1612 = vmatpush3.bf16.msra.mxu0 %v1712_v57  ;;  %v747_v63 = vrot.slane %v1992_v60, 1  ;;  %v779_v6 = vrot.slane %v1992_v60, 2 }
  0x2a   : > { %1644 = vmatprep.subr.bf16.mxu0 %v1740_v58  ;;  %753 = vrot.lane.b32.xlu0 %v745_v61, %s1741_s10 }
  0x2c   : > { %v1995_v62 = vld [vmem:[#allocation2 + $0xc] sm:$0xf]  ;;  %v2003_v1 = vld [vmem:[#allocation2 + $0x1c] sm:$0xf] }
  0x2d   : > { %883 = vrot.lane.b32.xlu1 %v1995_v62, %s1739_s20  ;;  %v2001_v0 = vld [vmem:[#allocation2 + $0x20] sm:$0xf] }
  0x2e   : > { %757 = vrot.lane.b32.xlu0 %v747_v63, %s1741_s10  ;;  %v749_v2 = vrot.slane %v2001_v0, 1  ;;  %v2009_v3 = vld [vmem:[#allocation2 + $0x30] sm:$0xf] }
  0x2f   : > { %v751_v4 = vrot.slane %v2009_v3, 1 }
  0x31   : > { %887 = vrot.lane.b32.xlu1 %v2003_v1, %s1739_s20 }
  0x32   : > { %761 = vrot.lane.b32.xlu0 %v749_v2, %s1741_s10 }
  0x36   : > { %765 = vrot.lane.b32.xlu0 %v751_v4, %s1741_s10 }
  0x3a   : > { %785 = vrot.lane.b32.xlu0 %v777_v5, %s1739_s20 }
  0x3e   : > { %789 = vrot.lane.b32.xlu0 %v779_v6, %s1739_s20 }
  0x88   : > { %v1679_v22 = vpop.permute.xlu1 %1678 }
  0x89   : > { %v1669_v23 = vpop.permute.xlu0 %1668  ;;  %v1681_v29 = vunpack.i.h.bf16 %v1679_v22  ;;  %v1680_v32 = vunpack.i.l.bf16 %v1679_v22 }
  0x8a   : > { %v1671_v33 = vunpack.i.h.bf16 %v1669_v23  ;;  %v1670_v34 = vunpack.i.l.bf16 %v1669_v23 }
  0x8b   : > { %v321_v48 = vsel %vm315_vm2, %v250_v11, %v1681_v29  ;;  %v320_v49 = vsel %vm315_vm2, %v249_v10, %v1680_v32 }
  0x8c   : > { %v1684_v38 = vpop.permute.xlu1 %1683  ;;  %v317_v52 = vsel %vm315_vm2, %v244_v16, %v1671_v33  ;;  %v316_v8 = vsel %vm315_vm2, %v243_v13, %v1670_v34  ;;  %v372_v12 = vcombine.low %v320_v49, %v321_v48 }
  0x8d   : > { %v1686_v39 = vunpack.i.h.bf16 %v1684_v38  ;;  %v1685_v40 = vunpack.i.l.bf16 %v1684_v38  ;;  %v1674_v42 = vpop.permute.xlu0 %1673  ;;  %v340_v54 = vcombine.low %v316_v8, %v317_v52  ;;  %v2068_v38 = vld [vmem:[#allocation2 + $0x2c] sm:$0xf] }
  0x8e   : > { %v1676_v46 = vunpack.i.h.bf16 %v1674_v42  ;;  %v1675_v47 = vunpack.i.l.bf16 %v1674_v42  ;;  %891 = vrot.lane.b32.xlu1 %v2068_v38, %s1739_s20  ;;  %v783_v42 = vrot.slane %v2009_v3, 2 }
  0x8f   : > { %v323_v50 = vsel %vm315_vm2, %v253_v18, %v1686_v39  ;;  %v322_v51 = vsel %vm315_vm2, %v252_v17, %v1685_v40  ;;  %v2042_v18 = vsub.s32 %v343_v43, %v345_v44  ;;  %v781_v39 = vrot.slane %v2001_v0, 2  ;;  %v2074_v40 = vld [vmem:[#allocation2 + $0x3c] sm:$0xf] }
  0x90   : > { %v319_v7 = vsel %vm315_vm2, %v247_v30, %v1676_v46  ;;  %v318_v10 = vsel %vm315_vm2, %v246_v25, %v1675_v47  ;;  %v1694_v11 = vpop.permute.xlu1 %1693  ;;  %v388_v16 = vcombine.low %v322_v51, %v323_v50  ;;  %v905_v43 = vrot.slane %v1995_v62, 1  ;;  %v1713_v47 = vld [vmem:[%s2398_s3 + $0x88] sm:$0xff]  }
  0x91   : > { %v1696_v14 = vunpack.i.h.bf16 %v1694_v11  ;;  %v1695_v15 = vunpack.i.l.bf16 %v1694_v11  ;;  %v1689_v17 = vpop.permute.xlu0 %1688  ;;  %v356_v13 = vcombine.low %v318_v10, %v319_v7  ;;  %v379_v26 = vrot.slane %v372_v12, %v2042_v18  ;;  %793 = vrot.lane.b32.xlu0 %v781_v39, %s1739_s20 }
  0x92   : > { %v1691_v53 = vunpack.i.h.bf16 %v1689_v17  ;;  %v1690_v9 = vunpack.i.l.bf16 %v1689_v17  ;;  %v395_v21 = vrot.slane %v388_v16, %v2042_v18  ;;  %v347_v63 = vrot.slane %v340_v54, %v2042_v18  ;;  %895 = vrot.lane.b32.xlu1 %v2074_v40, %s1739_s20 }
  0x93   : > { %v327_v20 = vsel %vm315_vm2, %v254_v36, %v1696_v14  ;;  %v326_v19 = vsel %vm315_vm2, %v251_v35, %v1695_v15  ;;  %v906_v44 = vrot.slane %v2003_v1, 1  ;;  %v907_v46 = vrot.slane %v2068_v38, 1 }
  0x94   : > { %v380_v25 = vcombine.low %v321_v48, %v326_v19  ;;  %v396_v30 = vcombine.low %v323_v50, %v327_v20  ;;  %v325_v55 = vsel %vm315_vm2, %v248_v45, %v1691_v53  ;;  %v324_v56 = vsel %vm315_vm2, %v245_v41, %v1690_v9  ;;  %v1714_v48 = vld [vmem:[%s2398_s3 + $0x80] sm:$0xff]  }
  0x95   : > { %v348_v57 = vcombine.low %v317_v52, %v324_v56  ;;  %v364_v61 = vcombine.low %v319_v7, %v325_v55  ;;  %v363_v45 = vrot.slane %v356_v13, %v2042_v18  ;;  %797 = vrot.lane.b32.xlu0 %v783_v42, %s1739_s20 }
  0x96   : > { %v387_v36 = vrot.slane %v380_v25, %v2042_v18  ;;  %v403_v35 = vrot.slane %v396_v30, %v2042_v18  ;;  %911 = vrot.lane.b32.xlu1 %v905_v43, %s1743_s11 }
  0x97   : > { %v355_v37 = vrot.slane %v348_v57, %v2042_v18  ;;  %v371_v31 = vrot.slane %v364_v61, %v2042_v18 }
  0x98   : > { %v422_v2 = vcombine.low %v379_v26, %v387_v36  ;;  %v423_v41 = vcombine.low %v395_v21, %v403_v35 }
  0x99   : > { %v404_v4 = vcombine.low %v347_v63, %v355_v37  ;;  %v405_v5 = vcombine.low %v363_v45, %v371_v31  ;;  %v934_v45 = vrot.slane %v2003_v1, 2 }
  0x9a   : > { %v430_v6 = vrot.slane %v422_v2, %v2042_v18  ;;  %v437_v22 = vrot.slane %v423_v41, %v2042_v18  ;;  %915 = vrot.lane.b32.xlu1 %v906_v44, %s1743_s11  ;;  %v933_v2 = vrot.slane %v1995_v62, 2 }
  0x9b   : > { %v412_v23 = vrot.slane %v404_v4, %v2042_v18  ;;  %v419_v24 = vrot.slane %v405_v5, %v2042_v18  ;;  %v935_v4 = vrot.slane %v2068_v38, 2 }
  0x9c   : > { %v439_v27 = vcombine.high %v430_v6, %v437_v22  ;;  %v438_v28 = vcombine.low %v430_v6, %v437_v22  ;;  %v754_v49 = vpop.permute.xlu0 %753  ;;  %v1065_v22 = vrot.slane %v934_v45, %v2042_v18  ;;  %v1726_v45 = vld [vmem:[%s2398_s3 + $0x10] sm:$0xff]  }
  0x9d   : > { %v421_v29 = vcombine.high %v412_v23, %v419_v24  ;;  %v420_v32 = vcombine.low %v412_v23, %v419_v24  ;;  %v938_v8 = vsel %vm937_vm4, %v1990_v59, %v754_v49  ;;  %v1549_v59 = vld [vmem:[%s2397_s2] ss:$0 sm:$0xff]  ;;  %v936_v23 = vrot.slane %v2074_v40, 2 }
  0x9e   : > { %919 = vrot.lane.b32.xlu1 %v907_v46, %s1743_s11  ;;  %v1033_v24 = vrot.slane %v933_v2, %v2042_v18  ;;  %v1727_v2 = vld [vmem:[%s2398_s3 + $0x48] sm:$0xff]  }
  0x9f   : > { %v445_v33 = vpack.c.bf16 %v439_v27, %v421_v29  ;;  %v444_v34 = vpack.c.bf16 %v438_v28, %v420_v32  ;;  %v1097_v28 = vrot.slane %v935_v4, %v2042_v18  ;;  %v1129_v38 = vrot.slane %v936_v23, %v2042_v18  ;;  %v1728_v4 = vld [vmem:[%s2398_s3 + $0x8] sm:$0xff]  }
  0xa0   : > { %v758_v50 = vpop.permute.xlu0 %757  ;;  %v908_v23 = vrot.slane %v2074_v40, 1 }
  0xa1   : > { %613 = vmatprep.mubr.bf16.mxu0 %v445_v33  ;;  %v940_v11 = vsel %vm937_vm4, %v1992_v60, %v758_v50 }
  0xa2   : > { %614 = vmatmul.mubr.bf16.vlgmr.msra.gmra.mxu0 %v444_v34 }
  0xa3   : > { %1645 = vmatpush3.bf16.msra.mxu0 %v1713_v47  ;;  %1648 = vmatprep.mubr.msk.bf16.mxu0 %vm1744_vm3, %v1740_v58 }
  0xa4   : > { %1646 = vmatprep.subr.bf16.mxu0 %v1740_v58  ;;  %v762_v51 = vpop.permute.xlu0 %761 }
  0xa5   : > { %v942_v58 = vsel %vm937_vm4, %v2001_v0, %v762_v51 }
  0xa7   : > { %1647 = vmatpush3.bf16.msra.mxu0 %v1714_v48 }
  0xa8   : > { %v2094_v52 = vpop.permute.xlu0 %765 }
  0xac   : > { %v786_v7 = vpop.permute.xlu0 %785 }
  0xad   : > { %v2099_v10 = vsel %vm315_vm2, %v938_v8, %v786_v7 }
  0xb0   : > { %v790_v14 = vpop.permute.xlu0 %789 }
  0xb1   : > { %v2104_v15 = vsel %vm315_vm2, %v940_v11, %v790_v14 }
 0x103   : > { %v794_v17 = vpop.permute.xlu0 %793 }
 0x104   : > { %v2109_v12 = vsel %vm315_vm2, %v942_v58, %v794_v17 }
 0x162   : > { %v1613_v16 = vpop.f32.mrf.mxu0 }
 0x164   : > { %v1614_v53 = vpop.f32.mrf.mxu0 }
 0x165   : > { %v1615_v9 = vadd.f32 %v1614_v53, %v1613_v16 }
 0x166   : > { %v1616_v54 = vpop.f32.mrf.mxu0 }
 0x167   : > { %v616_v60 = vadd.f32 %v1615_v9, %v1549_v59 }
 0x168   : > { %v1617_v13 = vpop.f32.mrf.mxu0 }
 0x169   : > { %v622_v20 = vmax.f32 %v616_v60, 0.0  ;;  %v1618_v19 = vadd.f32 %v1617_v13, %v1616_v54  ;;  %v1715_v60 = vld [vmem:[%s2398_s3 + $0x78] sm:$0xff]  }
 0x16a   : > { %v1716_v13 = vld [vmem:[%s2398_s3 + $0x38] sm:$0xff]   ;;  %1619 = vmatprep.subr.bf16.mxu1 %v1715_v60 }
 0x16b   : > { %v669_v25 = vcombine.high %v622_v20, %v622_v20  ;;  %v676_v0 = vrot.slane %v622_v20, %v2042_v18  ;;  %v619_v30 = vadd.f32 %v1618_v19, %v1549_v59  ;;  %1620 = vmatpush3.bf16.msra.mxu1 %v1716_v13  ;;  %v1717_v20 = vld [vmem:[%s2398_s3 + $0x70] sm:$0xff]  }
 0x16c   : > { %1621 = vmatprep.subr.bf16.mxu1 %v1717_v20 }
 0x16d   : > { %v683_v55 = vrot.slane %v669_v25, %v2042_v18  ;;  %v684_v56 = vcombine.high %v676_v0, %v676_v0  ;;  %713 = vst.msk [vmem:[#allocation2 + $0x5] sm:$0x3] %vm712_vm5, %v676_v0  ;;  %v623_v57 = vmax.f32 %v619_v30, 0.0  ;;  %v1718_v25 = vld [vmem:[%s2398_s3 + $0x30] sm:$0xff]   ;;  %v1719_v30 = vld [vmem:[%s2398_s3 + $0x68] sm:$0xff]  }
 0x16f   : > { %v685_v61 = vcombine.high %v683_v55, %v683_v55  ;;  %714 = vst.msk [vmem:[#allocation2 + $0x9] sm:$0x3] %vm712_vm5, %v684_v56  ;;  %715 = vst.msk [vmem:[#allocation2 + $0x15] sm:$0x3] %vm712_vm5, %v683_v55  ;;  %v686_v26 = vcombine.high %v623_v57, %v623_v57  ;;  %v693_v36 = vrot.slane %v623_v57, %v2042_v18  ;;  %1622 = vmatpush3.bf16.msra.mxu1 %v1718_v25  ;;  %v1720_v55 = vld [vmem:[%s2398_s3 + $0x28] sm:$0xff]  }
 0x170   : > { %1623 = vmatprep.subr.bf16.mxu1 %v1719_v30 }
 0x171   : > { %716 = vst.msk [vmem:[#allocation2 + $0x19] sm:$0x3] %vm712_vm5, %v685_v61  ;;  %v700_v21 = vrot.slane %v686_v26, %v2042_v18  ;;  %v701_v35 = vcombine.high %v693_v36, %v693_v36  ;;  %717 = vst.msk [vmem:[#allocation2 + $0x25] sm:$0x3] %vm712_vm5, %v693_v36  ;;  %v1721_v61 = vld [vmem:[%s2398_s3 + $0x60] sm:$0xff]   ;;  %v1723_v36 = vld [vmem:[%s2398_s3 + $0x58] sm:$0xff]  }
 0x172   : > { %v1722_v26 = vld [vmem:[%s2398_s3 + $0x20] sm:$0xff]  }
 0x173   : > { %v702_v63 = vcombine.high %v700_v21, %v700_v21  ;;  %718 = vst.msk [vmem:[#allocation2 + $0x29] sm:$0x3] %vm712_vm5, %v701_v35  ;;  %719 = vst.msk [vmem:[#allocation2 + $0x35] sm:$0x3] %vm712_vm5, %v700_v21  ;;  %1624 = vmatpush3.bf16.msra.mxu1 %v1720_v55  ;;  %v1724_v21 = vld [vmem:[%s2398_s3 + $0x18] sm:$0xff]  }
 0x174   : > { %v2125_v37 = vld [vmem:[#allocation2 + $0x4] sm:$0xf]  ;;  %1625 = vmatprep.subr.bf16.mxu1 %v1721_v61 }
 0x175   : > { %720 = vst.msk [vmem:[#allocation2 + $0x39] sm:$0x3] %vm712_vm5, %v702_v63  ;;  %813 = vrot.lane.b32.xlu0 %v2125_v37, %s1743_s11  ;;  %v746_v31 = vrot.slane %v2125_v37, 1  ;;  %v778_v5 = vrot.slane %v2125_v37, 2  ;;  %v1725_v63 = vld [vmem:[%s2398_s3 + $0x50] sm:$0xff]  }
 0x176   : > { %v2133_v41 = vld [vmem:[#allocation2 + $0x8] sm:$0xf]  ;;  %v2164_v44 = vld [vmem:[#allocation2 + $0x14] sm:$0xf] }
 0x177   : > { %755 = vrot.lane.b32.xlu1 %v746_v31, %s1741_s10  ;;  %v849_v1 = vrot.slane %v2133_v41, 2  ;;  %v748_v49 = vrot.slane %v2164_v44, 1  ;;  %v780_v8 = vrot.slane %v2164_v44, 2  ;;  %v837_v53 = vrot.slane %v2133_v41, 1  ;;  %1626 = vmatpush3.bf16.msra.mxu1 %v1722_v26 }
 0x178   : > { %v2141_v6 = vld [vmem:[#allocation2 + $0x18] sm:$0xf]  ;;  %v2188_v59 = vld [vmem:[#allocation2 + $0x24] sm:$0xf]  ;;  %1627 = vmatprep.subr.bf16.mxu1 %v1723_v36 }
 0x179   : > { %853 = vrot.lane.b32.xlu0 %v778_v5, %s1741_s10  ;;  %v850_v62 = vrot.slane %v2141_v6, 2  ;;  %v1017_v29 = vrot.slane %v849_v1, %v2042_v18  ;;  %v750_v9 = vrot.slane %v2188_v59, 1  ;;  %v782_v54 = vrot.slane %v2188_v59, 2 }
 0x17a   : > { %v2148_v27 = vld [vmem:[#allocation2 + $0x28] sm:$0xf]  ;;  %v2217_v19 = vld [vmem:[#allocation2 + $0x34] sm:$0xf]  ;;  %v838_v0 = vrot.slane %v2141_v6, 1 }
 0x17b   : > { %787 = vrot.lane.b32.xlu1 %v778_v5, %s1739_s20  ;;  %v1049_v32 = vrot.slane %v850_v62, %v2042_v18  ;;  %v851_v33 = vrot.slane %v2148_v27, 2  ;;  %v1567_v46 = vcombine.low %v1017_v29, %v1033_v24  ;;  %v752_v56 = vrot.slane %v2217_v19, 1  ;;  %1628 = vmatpush3.bf16.msra.mxu1 %v1724_v21 }
 0x17c   : > { %v2155_v34 = vld [vmem:[#allocation2 + $0x38] sm:$0xf]  ;;  %v784_v57 = vrot.slane %v2217_v19, 2  ;;  %v839_v35 = vrot.slane %v2148_v27, 1  ;;  %1629 = vmatprep.subr.bf16.mxu1 %v1725_v63 }
 0x17d   : > { %881 = vrot.lane.b32.xlu0 %v2133_v41, %s1739_s20  ;;  %v1569_v39 = vcombine.low %v1049_v32, %v1065_v22  ;;  %v852_v42 = vrot.slane %v2155_v34, 2  ;;  %v1081_v43 = vrot.slane %v851_v33, %v2042_v18  ;;  %v1148_v7 = vrot.slane %v1567_v46, %v2042_v18  ;;  %v1730_v22 = vld [vmem:[%s2398_s3] sm:$0xff]  }
 0x17e   : > { %v840_v5 = vrot.slane %v2155_v34, 1 }
 0x17f   : > { %815 = vrot.lane.b32.xlu1 %v2133_v41, %s1743_s11  ;;  %v1113_v47 = vrot.slane %v852_v42, %v2042_v18  ;;  %v1571_v48 = vcombine.low %v1081_v43, %v1097_v28  ;;  %v1162_v50 = vrot.slane %v1569_v39, %v2042_v18  ;;  %1630 = vmatpush3.bf16.msra.mxu1 %v1726_v45 }
 0x180   : > { %1631 = vmatprep.subr.bf16.mxu1 %v1727_v2 }
 0x181   : > { %817 = vrot.lane.b32.xlu0 %v2164_v44, %s1743_s11  ;;  %v1573_v51 = vcombine.low %v1113_v47, %v1129_v38  ;;  %v1183_v11 = vrot.slane %v1571_v48, %v2042_v18  ;;  %v1165_v58 = vcombine.low %v1148_v7, %v1162_v50  ;;  %v2297_v38 = vpop.permute.xlu0 %797 }
 0x183   : > { %759 = vrot.lane.b32.xlu1 %v748_v49, %s1741_s10  ;;  %v1197_v14 = vrot.slane %v1573_v51, %v2042_v18  ;;  %1632 = vmatpush3.bf16.msra.mxu1 %v1728_v4 }
 0x185   : > { %857 = vrot.lane.b32.xlu0 %v780_v8, %s1741_s10  ;;  %v1200_v17 = vcombine.low %v1183_v11, %v1197_v14 }
 0x187   : > { %855 = vrot.lane.b32.xlu1 %v849_v1, %s1741_s10  ;;  %v1209_v16 = vpack.c.bf16 %v1200_v17, %v1165_v58  ;;  %v1729_v1 = vld [vmem:[%s2398_s3 + $0x40] sm:$0xff]  }
 0x188   : > { %1633 = vmatprep.subr.bf16.mxu1 %v1729_v1 }
 0x189   : > { %885 = vrot.lane.b32.xlu0 %v2141_v6, %s1739_s20  ;;  %1649 = vmatmul.mubr.msk.bf16.vlgmr.msra.gmra.mxu0 %vm937_vm4, %v1209_v16 }
 0x18a   : > { %1634 = vmatpush3.bf16.msra.mxu1 %v1730_v22 }
 0x18b   : > { %791 = vrot.lane.b32.xlu1 %v780_v8, %s1739_s20 }
 0x18d   : > { %821 = vrot.lane.b32.xlu0 %v2188_v59, %s1743_s11 }
 0x18f   : > { %819 = vrot.lane.b32.xlu1 %v2141_v6, %s1743_s11 }
 0x191   : > { %909 = vrot.lane.b32.xlu0 %v837_v53, %s1743_s11 }
 0x193   : > { %763 = vrot.lane.b32.xlu1 %v750_v9, %s1741_s10 }
 0x195   : > { %861 = vrot.lane.b32.xlu0 %v782_v54, %s1741_s10 }
 0x197   : > { %859 = vrot.lane.b32.xlu1 %v850_v62, %s1741_s10  ;;  %v884_v62 = vpop.permute.xlu1 %883 }
 0x199   : > { %889 = vrot.lane.b32.xlu0 %v2148_v27, %s1739_s20 }
 0x19b   : > { %795 = vrot.lane.b32.xlu1 %v782_v54, %s1739_s20  ;;  %v888_v24 = vpop.permute.xlu1 %887 }
 0x19d   : > { %825 = vrot.lane.b32.xlu0 %v2217_v19, %s1743_s11 }
 0x19f   : > { %823 = vrot.lane.b32.xlu1 %v2148_v27, %s1743_s11  ;;  %v2293_v28 = vpop.permute.xlu1 %891 }
 0x1a1   : > { %913 = vrot.lane.b32.xlu0 %v838_v0, %s1743_s11 }
 0x1a3   : > { %767 = vrot.lane.b32.xlu1 %v752_v56, %s1741_s10  ;;  %v2295_v29 = vpop.permute.xlu1 %895 }
 0x1a5   : > { %865 = vrot.lane.b32.xlu0 %v784_v57, %s1741_s10 }
 0x1a7   : > { %863 = vrot.lane.b32.xlu1 %v851_v33, %s1741_s10  ;;  %v912_v32 = vpop.permute.xlu1 %911 }
 0x1a9   : > { %893 = vrot.lane.b32.xlu0 %v2155_v34, %s1739_s20 }
 0x1ab   : > { %799 = vrot.lane.b32.xlu1 %v784_v57, %s1739_s20  ;;  %v916_v33 = vpop.permute.xlu1 %915 }
 0x1ad   : > { %917 = vrot.lane.b32.xlu0 %v839_v35, %s1743_s11 }
 0x1af   : > { %827 = vrot.lane.b32.xlu1 %v2155_v34, %s1743_s11  ;;  %v2299_v39 = vpop.permute.xlu1 %919 }
 0x1b1   : > { %921 = vrot.lane.b32.xlu0 %v840_v5, %s1743_s11 }
 0x1b3   : > { %867 = vrot.lane.b32.xlu1 %v852_v42, %s1741_s10 }
 0x1b7   : > { %923 = vrot.lane.b32.xlu1 %v908_v23, %s1743_s11 }
 0x1e7   : > { %v814_v43 = vpop.permute.xlu0 %813 }
 0x1e8   : > { %v955_v36 = vsel %vm954_vm6, %v2099_v10, %v814_v43 }
 0x1e9   : > { %v756_v42 = vpop.permute.xlu1 %755 }
 0x1eb   : > { %v854_v46 = vpop.permute.xlu0 %853 }
 0x1ec   : > { %v963_v25 = vsel %vm937_vm4, %v746_v31, %v854_v46  ;;  %v939_v31 = vsel %vm937_vm4, %v2125_v37, %v756_v42 }
 0x1ed   : > { %v788_v40 = vpop.permute.xlu1 %787 }
 0x1ef   : > { %v882_v47 = vpop.permute.xlu0 %881 }
 0x1f0   : > { %v971_v55 = vsel %vm315_vm2, %v963_v25, %v882_v47 }
 0x1f1   : > { %v816_v48 = vpop.permute.xlu1 %815 }
 0x1f3   : > { %v818_v50 = vpop.permute.xlu0 %817 }
 0x1f4   : > { %v957_v42 = vsel %vm954_vm6, %v2104_v15, %v818_v50 }
 0x1f5   : > { %v760_v51 = vpop.permute.xlu1 %759 }
 0x1f6   : > { %v941_v2 = vsel %vm937_vm4, %v2164_v44, %v760_v51 }
 0x1f7   : > { %v858_v8 = vpop.permute.xlu0 %857 }
 0x1f8   : > { %v965_v37 = vsel %vm937_vm4, %v748_v49, %v858_v8 }
 0x1f9   : > { %v856_v7 = vpop.permute.xlu1 %855 }
 0x1fa   : > { %v964_v13 = vsel %vm937_vm4, %v837_v53, %v856_v7 }
 0x1fb   : > { %v886_v11 = vpop.permute.xlu0 %885  ;;  %v972_v57 = vsel %vm315_vm2, %v964_v13, %v884_v62 }
 0x1fc   : > { %v980_v6 = vsel %vm954_vm6, %v972_v57, %v912_v32  ;;  %v973_v62 = vsel %vm315_vm2, %v965_v37, %v886_v11 }
 0x1fd   : > { %v792_v14 = vpop.permute.xlu1 %791 }
 0x1fe   : > { %v949_v22 = vsel %vm315_vm2, %v941_v2, %v792_v14 }
 0x1ff   : > { %v822_v58 = vpop.permute.xlu0 %821 }
 0x201   : > { %v820_v17 = vpop.permute.xlu1 %819 }
 0x202   : > { %v958_v23 = vsel %vm954_vm6, %v949_v22, %v820_v17 }
 0x203   : > { %v910_v16 = vpop.permute.xlu0 %909 }
 0x204   : > { %v979_v26 = vsel %vm954_vm6, %v971_v55, %v910_v16 }
 0x205   : > { %v764_v54 = vpop.permute.xlu1 %763  ;;  %v1003_v21 = vcombine.low %v955_v36, %v979_v26 }
 0x206   : > { %v943_v16 = vsel %vm937_vm4, %v2188_v59, %v764_v54  ;;  %v959_v54 = vsel %vm954_vm6, %v2109_v12, %v822_v58 }
 0x207   : > { %v862_v60 = vpop.permute.xlu0 %861 }
 0x209   : > { %v860_v20 = vpop.permute.xlu1 %859 }
 0x20a   : > { %v966_v30 = vsel %vm937_vm4, %v838_v0, %v860_v20  ;;  %v947_v0 = vsel %vm315_vm2, %v939_v31, %v788_v40 }
 0x20b   : > { %v890_v61 = vpop.permute.xlu0 %889  ;;  %v974_v41 = vsel %vm315_vm2, %v966_v30, %v888_v24  ;;  %v956_v45 = vsel %vm954_vm6, %v947_v0, %v816_v48  ;;  %v1010_v24 = vrot.slane %v1003_v21, %v2042_v18 }
 0x20c   : > { %v982_v4 = vsel %vm954_vm6, %v974_v41, %v916_v33  ;;  %v1019_v1 = vcombine.low %v956_v45, %v980_v6 }
 0x20d   : > { %v796_v53 = vpop.permute.xlu1 %795  ;;  %v1051_v32 = vcombine.low %v958_v23, %v982_v4 }
 0x20e   : > { %v1026_v47 = vrot.slane %v1019_v1, %v2042_v18  ;;  %v951_v20 = vsel %vm315_vm2, %v943_v16, %v796_v53 }
 0x20f   : > { %v826_v63 = vpop.permute.xlu0 %825  ;;  %v1058_v48 = vrot.slane %v1051_v32, %v2042_v18 }
 0x210   : > { %v1566_v51 = vcombine.low %v1010_v24, %v1026_v47 }
 0x211   : > { %v824_v10 = vpop.permute.xlu1 %823 }
 0x212   : > { %v1141_v14 = vrot.slane %v1566_v51, %v2042_v18 }
 0x213   : > { %v914_v43 = vpop.permute.xlu0 %913 }
 0x214   : > { %v981_v33 = vsel %vm954_vm6, %v973_v62, %v914_v43 }
 0x215   : > { %v1035_v46 = vcombine.low %v957_v42, %v981_v33  ;;  %v768_v40 = vpop.permute.xlu1 %767 }
 0x217   : > { %v1042_v44 = vrot.slane %v1035_v46, %v2042_v18  ;;  %v866_v49 = vpop.permute.xlu0 %865  ;;  %v1574_v46 = vld [vmem:[%s2399_s4] ss:$0 sm:$0xff] }
 0x219   : > { %v864_v8 = vpop.permute.xlu1 %863  ;;  %v1568_v7 = vcombine.low %v1042_v44, %v1058_v48 }
 0x21a   : > { %v968_v11 = vsel %vm937_vm4, %v839_v35, %v864_v8  ;;  %v967_v35 = vsel %vm937_vm4, %v750_v9, %v862_v60  ;;  %v944_v9 = vsel %vm937_vm4, %v2009_v3, %v2094_v52  ;;  %v969_v60 = vsel %vm937_vm4, %v752_v56, %v866_v49 }
 0x21b   : > { %v976_v15 = vsel %vm315_vm2, %v968_v11, %v2293_v28  ;;  %v894_v50 = vpop.permute.xlu0 %893  ;;  %v1155_v17 = vrot.slane %v1568_v7, %v2042_v18  ;;  %v960_v28 = vsel %vm954_vm6, %v951_v20, %v824_v10  ;;  %v975_v55 = vsel %vm315_vm2, %v967_v35, %v890_v61 }
 0x21c   : > { %v984_v13 = vsel %vm954_vm6, %v976_v15, %v2299_v39  ;;  %v977_v61 = vsel %vm315_vm2, %v969_v60, %v894_v50  ;;  %v952_v21 = vsel %vm315_vm2, %v944_v9, %v2297_v38  ;;  %v945_v3 = vsel %vm937_vm4, %v2217_v19, %v768_v40 }
 0x21d   : > { %v800_v25 = vpop.permute.xlu1 %799  ;;  %v1164_v27 = vcombine.high %v1141_v14, %v1155_v17  ;;  %v1163_v30 = vcombine.low %v1141_v14, %v1155_v17  ;;  %v1083_v57 = vcombine.low %v960_v28, %v984_v13  ;;  %v961_v45 = vsel %vm954_vm6, %v952_v21, %v826_v63 }
 0x21e   : > { %v953_v52 = vsel %vm315_vm2, %v945_v3, %v800_v25 }
 0x21f   : > { %v918_v26 = vpop.permute.xlu0 %917  ;;  %v1090_v59 = vrot.slane %v1083_v57, %v2042_v18 }
 0x220   : > { %v983_v39 = vsel %vm954_vm6, %v975_v55, %v918_v26 }
 0x221   : > { %v1067_v41 = vcombine.low %v959_v54, %v983_v39  ;;  %v828_v53 = vpop.permute.xlu1 %827 }
 0x222   : > { %v962_v1 = vsel %vm954_vm6, %v953_v52, %v828_v53 }
 0x223   : > { %v1074_v36 = vrot.slane %v1067_v41, %v2042_v18  ;;  %v922_v31 = vpop.permute.xlu0 %921 }
 0x224   : > { %v985_v6 = vsel %vm954_vm6, %v977_v61, %v922_v31 }
 0x225   : > { %v868_v12 = vpop.permute.xlu1 %867  ;;  %v1570_v58 = vcombine.low %v1074_v36, %v1090_v59  ;;  %v1099_v56 = vcombine.low %v961_v45, %v985_v6 }
 0x226   : > { %v970_v0 = vsel %vm937_vm4, %v840_v5, %v868_v12 }
 0x227   : > { %v978_v2 = vsel %vm315_vm2, %v970_v0, %v2295_v29  ;;  %v1106_v22 = vrot.slane %v1099_v56, %v2042_v18  ;;  %v1176_v10 = vrot.slane %v1570_v58, %v2042_v18 }
 0x229   : > { %v924_v4 = vpop.permute.xlu1 %923 }
 0x22a   : > { %v986_v34 = vsel %vm954_vm6, %v978_v2, %v924_v4 }
 0x22b   : > { %v1115_v5 = vcombine.low %v962_v1, %v986_v34 }
 0x22d   : > { %v1122_v38 = vrot.slane %v1115_v5, %v2042_v18 }
 0x22f   : > { %v1572_v63 = vcombine.low %v1106_v22, %v1122_v38 }
 0x231   : > { %v1190_v19 = vrot.slane %v1572_v63, %v2042_v18 }
 0x233   : > { %v1199_v37 = vcombine.high %v1176_v10, %v1190_v19  ;;  %v1198_v23 = vcombine.low %v1176_v10, %v1190_v19 }
 0x235   : > { %v1208_v62 = vpack.c.bf16 %v1199_v37, %v1164_v27  ;;  %v1207_v24 = vpack.c.bf16 %v1198_v23, %v1163_v30 }
 0x237   : > { %1396 = vmatprep.mubr.bf16.mxu1 %v1208_v62 }
 0x238   : > { %1397 = vmatmul.mubr.bf16.vlgmr.msra.gmra.mxu1 %v1207_v24 }
 0x249   : > { %v1439_v29 = vpop.f32.mrf.mxu0 }
 0x24b   : > { %v1650_v32 = vpop.f32.mrf.mxu0 }
 0x24d   : > { %v1442_v43 = vpop.f32.mrf.mxu0 }
 0x24f   : > { %v1651_v42 = vpop.f32.mrf.mxu0 }
 0x2f8   : > { %v1635_v33 = vpop.f32.mrf.mxu1 }
 0x2fa   : > { %v1636_v40 = vpop.f32.mrf.mxu1 }
 0x2fb   : > { %v1637_v47 = vadd.f32 %v1636_v40, %v1635_v33 }
 0x2fc   : > { %v1638_v18 = vpop.f32.mrf.mxu1 }
 0x2fd   : > { %v1399_v44 = vadd.f32 %v1637_v47, %v1574_v46 }
 0x2fe   : > { %v1639_v49 = vpop.f32.mrf.mxu1 }
 0x2ff   : > { %v1640_v48 = vadd.f32 %v1639_v49, %v1638_v18  ;;  %v1440_v51 = vadd.f32 %v1439_v29, %v1399_v44 }
 0x301   : > { %v1402_v8 = vadd.f32 %v1640_v48, %v1574_v46  ;;  %v1446_v7 = vmax.f32 %v1440_v51, 0.0 }
 0x303   : > { %1448 = vxpose.xlu0.b32.start [1/2] (short) (narrow) %v1446_v7, 32  ;;  %v1443_v11 = vadd.f32 %v1442_v43, %v1402_v8 }
 0x305   : > { %v1447_v15 = vmax.f32 %v1443_v11, 0.0 }
 0x307   : > { %1449 = vxpose.xlu0.b32.end [2/2] (short) (narrow) %v1447_v15, 32 }
 0x37f   : > { %v1464_v50 = vpop.trf.xlu0 }
 0x380   : > { %1481 = vst.msk [vmem:[%s229_s12] sm:$0xff] %vm1480_vm7, %v1464_v50 }
 0x383   : > { %v1465_v14 = vpop.trf.xlu0 }
 0x384   : > { %1482 = vst.msk [vmem:[%s229_s12 + $0x8] sm:$0xff] %vm1480_vm7, %v1465_v14 }
 0x387   : > { %v1466_v17 = vpop.trf.xlu0 }
 0x388   : > { %1483 = vst.msk [vmem:[%s229_s12 + $0x10] sm:$0xff] %vm1480_vm7, %v1466_v17 }
 0x38b   : > { %v1467_v16 = vpop.trf.xlu0 }
 0x38c   : > { %1484 = vst.msk [vmem:[%s229_s12 + $0x18] sm:$0xff] %vm1480_vm7, %v1467_v16 }
 0x38d PF: > { %s15_s18 = sadd.s32 1, %s1737_s18  }
 0x38e   : > { %p12_p5 = scmp.ge.s32.totalorder %s15_s18, 4  }
 0x390   :  { %14 = sbr.rel (!%p12_p5) target bundleno = 1 (0x1), region = 72 }

</bundles_post_ra>
